<compile_context>
chip_gen: v5e
topology: v5e:2x2
jax: 0.10.0
libtpu: 0.0.40
codegen_flags: <defaults>
</compile_context>

<pallas_src>
import jax
import jax.numpy as jnp
import numpy as np
from jax import lax
from jax.experimental import pallas as pl
from jax.experimental.pallas import tpu as pltpu


def calculate_groups_for_channels(channels: int) -> int:
    for g in (32, 16, 8, 4, 2, 1):
        if channels % g == 0:
            return g
    return 1


# --------------------------------------------------------------------------------
# Fused Pallas kernel (one grid step == `nb` batch elements, stacked along sublanes).
# --------------------------------------------------------------------------------
def _make_kernel(nb, Ho, Wo, Cout, G, use_se, has_shortcut, gn_eps, conv_dtype):
    L = Wo * Cout
    M = nb * Ho
    Cg = Cout // G
    inv_cnt = 1.0 / float(Cg * Ho * Wo)
    rows_f = float(Ho)

    def kernel(*refs):
        it = iter(refs)
        nxt = lambda: next(it)
        x_ref = nxt()
        xid_ref = None if has_shortcut else nxt()
        w1_ref = nxt(); bn1s_ref = nxt(); bn1b_ref = nxt()
        w2_ref = nxt(); bn2s_ref = nxt(); bn2b_ref = nxt()
        gng_ref = nxt(); gnb_ref = nxt(); pcg_ref = nxt(); pgc_ref = nxt()
        if nb > 1:
            rsel_ref = nxt(); rselT_ref = nxt(); upm_ref = nxt(); dnm_ref = nxt()
        if use_se:
            sew1_ref = nxt(); seb1_ref = nxt(); sew2_ref = nxt(); seb2_ref = nxt()
        if has_shortcut:
            wsc_ref = nxt(); bnscs_ref = nxt(); bnscb_ref = nxt()
        o_ref = nxt()

        gamma = gng_ref[...]; beta = gnb_ref[...]
        pcg = pcg_ref[...]; pgc = pgc_ref[...]
        if nb > 1:
            rsel = rsel_ref[...]      # (nb, M) per-image row selector (0/1)
            rselT = rselT_ref[...]    # (M, nb) per-image row broadcaster

        def img_row_sums(v):          # (M, L) -> per-image row sums (nb, L)
            if nb == 1:
                return jnp.sum(v, axis=0, keepdims=True)
            return jnp.dot(rsel, v, preferred_element_type=jnp.float32)

        def apply_affine(acc, S, B):  # per-image (nb, L) affine applied to (M, L)
            if nb == 1:
                return acc * S + B
            sb = jnp.dot(rselT, jnp.concatenate([S, B], axis=-1),
                         preferred_element_type=jnp.float32)          # (M, 2L), exact 0/1 select
            return acc * sb[:, :L] + sb[:, L:]

        def bn_gn_affine(acc, bn_s, bn_b):
            # GroupNorm stats of the BatchNorm output derived from conv-accumulator sums;
            # BN + GN affine folded into one per-lane (S, B) per image.
            A1 = img_row_sums(acc)                                     # (nb, L)
            A2 = img_row_sums(acc * acc)
            Y1 = bn_s * A1 + rows_f * bn_b                             # sums of BN output
            Y2 = (bn_s * bn_s) * A2 + (2.0 * bn_s * bn_b) * A1 + rows_f * (bn_b * bn_b)
            g = jnp.dot(jnp.concatenate([Y1, Y2], axis=0), pcg,
                        preferred_element_type=jnp.float32) * inv_cnt  # (2nb, G)
            mean_g = g[:nb]
            var_g = jnp.maximum(g[nb:] - mean_g * mean_g, 0.0)         # clamp >= 0
            inv_g = lax.rsqrt(var_g + gn_eps)
            back = jnp.dot(jnp.concatenate([mean_g, inv_g], axis=0), pgc,
                           preferred_element_type=jnp.float32)         # (2nb, L)
            mean_l, inv_l = back[:nb], back[nb:]
            S = bn_s * inv_l * gamma
            B = (bn_b - mean_l) * inv_l * gamma + beta
            return S, B, A1

        xm = x_ref[...]                                     # (M, 3*(W+2)*Cin), conv dtype

        # ---- conv1: all 9 taps in ONE MXU push (host im2row over dy) -----------------
        acc1 = jnp.dot(xm, w1_ref[...], preferred_element_type=jnp.float32)   # (M, L)
        S1, B1, _ = bn_gn_affine(acc1, bn1s_ref[...], bn1b_ref[...])
        # BN + GN + ReLU in one full-slab pass, then a single cast to the MXU dtype.
        oc = jnp.maximum(apply_affine(acc1, S1, B1), 0.0).astype(conv_dtype)

        # ---- conv2: row shifts (zeroed at per-image boundaries) -> lane concat -> one push
        zrow = jnp.zeros((1, L), conv_dtype)
        up = jnp.concatenate([zrow, oc[:M - 1]], axis=0)
        dn = jnp.concatenate([oc[1:], zrow], axis=0)
        if nb > 1:
            up = up * upm_ref[...]        # zero rows that crossed an image boundary
            dn = dn * dnm_ref[...]
        lhs2 = jnp.concatenate([up, oc, dn], axis=-1)                          # (M, 3L)
        acc2 = jnp.dot(lhs2, w2_ref[...], preferred_element_type=jnp.float32)  # (M, L)
        S2, B2, A12 = bn_gn_affine(acc2, bn2s_ref[...], bn2b_ref[...])

        # ---- squeeze & excitation (pool sums come free from the GN row sums) ---------
        if use_se:
            ys = S2 * A12 + rows_f * B2                                        # (nb, L)
            h = jnp.maximum(jnp.dot(ys, sew1_ref[...],
                                    preferred_element_type=jnp.float32) + seb1_ref[...], 0.0)
            e = jax.nn.sigmoid(jnp.dot(h, sew2_ref[...],
                                       preferred_element_type=jnp.float32) + seb2_ref[...])
            S2 = S2 * e                                                        # fold SE gate
            B2 = B2 * e

        out2 = apply_affine(acc2, S2, B2)   # BN2 + GN + SE in one full-slab pass

        # ---- shortcut + residual ReLU + store (lane-dense (M, Wo*Cout) slab) ---------
        if has_shortcut:
            sc = jnp.dot(xm, wsc_ref[...], preferred_element_type=jnp.float32)
            res = jnp.maximum(out2 + (sc * bnscs_ref[...] + bnscb_ref[...]), 0.0)
            o_ref[...] = res.astype(o_ref.dtype)
            # TODO(synk): torch's NaN->identity fallback is shape-invalid when the
            # shortcut changes shape; not applied on this path.
        else:
            xid = xid_ref[...]                                                 # (M, L) f32
            res = jnp.maximum(out2 + xid, 0.0)
            # NaN probe: res >= 0, so any NaN in res <=> NaN in its sum (IEEE adds always
            # propagate NaN); one reduction, no isnan/where pass, issued before the store.
            probe = jnp.sum(jnp.sum(res, axis=1, keepdims=True), axis=0, keepdims=True)
            o_ref[...] = res.astype(o_ref.dtype)

            @pl.when(probe[0, 0] != probe[0, 0])
            def _():
                o_ref[...] = xid.astype(o_ref.dtype)

    return kernel


# --------------------------------------------------------------------------------
# Host-side packing: block-Toeplitz conv weights, per-lane affines, fold helpers.
# --------------------------------------------------------------------------------
def pack_params(params, H, W, Cin, Cout, G, stride, use_se, has_shortcut, conv_dtype, nb):
    Ho = (H - 1) // stride + 1
    Wo = (W - 1) // stride + 1
    L = Wo * Cout
    Wp = W + 2
    Cg = Cout // G
    Kin = 3 * Wp * Cin
    M = nb * Ho
    f32 = np.float32
    npy = lambda a: np.asarray(a, f32)

    def tile_c(v):                      # (Cout,) -> (1, Wo*Cout), channel-minor
        return jnp.asarray(np.tile(npy(v), Wo).reshape(1, L))

    # conv1: (dy, dx, Cin) all folded into the contraction dim -> one (Kin, L) matrix.
    w1 = npy(params["w1"])                                  # (3,3,Cin,Cout) HWIO
    W1 = np.zeros((3, Wp, Cin, Wo, Cout), f32)
    for dy in range(3):
        for x in range(Wo):
            for dx in range(3):
                W1[dy, x * stride + dx, :, x, :] = w1[dy, dx]
    W1 = W1.reshape(Kin, L)

    # conv2 (stride 1): column zero-padding folded into the weights; the three row
    # shifts arrive lane-concatenated, so a single (3L, L) matrix.
    w2 = npy(params["w2"])                                  # (3,3,Cout,Cout)
    W2 = np.zeros((3, Wo, Cout, Wo, Cout), f32)
    for dy in range(3):
        for x in range(Wo):
            for dx in range(3):
                xx = x + dx - 1
                if 0 <= xx < Wo:
                    W2[dy, xx, :, x, :] = w2[dy, dx]
    W2 = W2.reshape(3 * L, L)

    lane_c = np.arange(L) % Cout
    Pcg = ((lane_c // Cg)[:, None] == np.arange(G)[None, :]).astype(f32)     # (L, G)
    Pgc = np.ascontiguousarray(Pcg.T)                                        # (G, L)

    ops = [jnp.asarray(W1, conv_dtype),
           tile_c(params["bn1_scale"]), tile_c(params["bn1_bias"]),
           jnp.asarray(W2, conv_dtype),
           tile_c(params["bn2_scale"]), tile_c(params["bn2_bias"]),
           tile_c(params["gn_gamma"]), tile_c(params["gn_beta"]),
           jnp.asarray(Pcg), jnp.asarray(Pgc)]

    if nb > 1:
        rowsel = (np.arange(M)[None, :] // Ho == np.arange(nb)[:, None]).astype(f32)  # (nb, M)
        upmask = ((np.arange(M) % Ho) != 0).astype(f32).reshape(M, 1)
        dnmask = ((np.arange(M) % Ho) != Ho - 1).astype(f32).reshape(M, 1)
        ops += [jnp.asarray(rowsel), jnp.asarray(np.ascontiguousarray(rowsel.T)),
                jnp.asarray(upmask, conv_dtype), jnp.asarray(dnmask, conv_dtype)]

    if use_se:
        Pc = (lane_c[:, None] == np.arange(Cout)[None, :]).astype(f32)       # (L, Cout)
        se_w1 = npy(params["se_w1"]); hid = se_w1.shape[-1]
        se_w2 = npy(params["se_w2"])
        SeW1L = (Pc @ se_w1) / float(Ho * Wo)        # folds avg-pool one-hot + 1/(H*W)
        SeW2L = se_w2 @ np.ascontiguousarray(Pc.T)   # folds channel->lane broadcast
        ops += [jnp.asarray(SeW1L), jnp.asarray(npy(params["se_b1"]).reshape(1, hid)),
                jnp.asarray(SeW2L), tile_c(params["se_b2"])]

    if has_shortcut:
        wsc = npy(params["wsc"])                            # (Cin, Cout) 1x1 conv
        Wsc = np.zeros((3, Wp, Cin, Wo, Cout), f32)
        for x in range(Wo):
            Wsc[1, x * stride + 1, :, x, :] = wsc           # center row / center column
        ops += [jnp.asarray(Wsc.reshape(Kin, L), conv_dtype),
                tile_c(params["bnsc_scale"]), tile_c(params["bnsc_bias"])]
    return ops


def _choose_images_per_step(N, Ho):
    # Fold batch into the matmul M (sublane) dim, targeting >= 128 rows per MXU push,
    # while keeping >= 2 grid steps when possible so both v7x TensorCores get work.
    nb = min(N, max(1, 128 // max(1, Ho)))
    if N >= 2:
        nb = min(nb, max(1, N // 2))
    while N % nb:
        nb -= 1
    return nb


# --------------------------------------------------------------------------------
# Public wrapper (accepts NCHW like PyTorch)
# --------------------------------------------------------------------------------
def cnn_block_forward(x_nchw, params, *, stride=1, use_se=True,
                      conv_dtype=jnp.bfloat16, images_per_step=None):
    N, Cin, H, W = x_nchw.shape
    Cout = params["w1"].shape[-1]
    G = calculate_groups_for_channels(Cout)
    has_shortcut = (stride != 1) or (Cin != Cout)
    Ho = (H - 1) // stride + 1
    Wo = (W - 1) // stride + 1
    L = Wo * Cout
    Wp = W + 2
    Kin = 3 * Wp * Cin

    nb = images_per_step if images_per_step is not None else _choose_images_per_step(N, Ho)
    if N % nb:
        nb = 1
    if (nb * Ho) % 8 != 0 and nb != N:
        nb = N                               # full-dim block is always a legal block shape
    steps = N // nb
    M = nb * Ho

    # NCHW -> NHWC -> spatial pad -> host im2row over the 3 kernel rows: one
    # (Ho, 3*(W+2)*Cin) lane slab per image, so all 9 conv1 taps fold into one matmul K
    # (also makes stride>1 row access contiguous).
    x = jnp.transpose(x_nchw, (0, 2, 3, 1)).astype(jnp.float32)
    x_pad = jnp.pad(x, ((0, 0), (1, 1), (1, 1), (0, 0))).reshape(N, H + 2, Wp * Cin)
    rows = (np.arange(Ho) * stride)[:, None] + np.arange(3)[None, :]          # (Ho, 3)
    x_im2row = x_pad[:, rows.reshape(-1), :].reshape(N * Ho, Kin)
    if np.dtype(conv_dtype) != np.dtype(np.float32):
        x_im2row = x_im2row.astype(conv_dtype)   # DMA conv operands as bf16 (halves traffic)

    ops = pack_params(params, H, W, Cin, Cout, G, stride, use_se,
                      has_shortcut, conv_dtype, nb)
    kernel = _make_kernel(nb, Ho, Wo, Cout, G, use_se, has_shortcut,
                          gn_eps=1e-5, conv_dtype=conv_dtype)

    inputs = [x_im2row]
    in_specs = [pl.BlockSpec((M, Kin), lambda n: (n, 0))]
    if not has_shortcut:
        # identity residual, already lane-dense ((W*Cin == Wo*Cout)); kept in f32
        inputs.append(x.reshape(N * Ho, W * Cin))
        in_specs.append(pl.BlockSpec((M, L), lambda n: (n, 0)))
    inputs += ops
    in_specs += [pl.BlockSpec(a.shape, lambda n, _nd=a.ndim: (0,) * _nd) for a in ops]
    # TODO(synk): when weights grow, single-buffer the constant operands
    # (pipeline_mode=pl.Buffered(1)) and/or switch to the row-tiled (H*Wo, C) layout
    # with manually DMA'd weights; negligible at these sizes.

    out = pl.pallas_call(
        kernel,
        out_shape=jax.ShapeDtypeStruct((N * Ho, L), jnp.float32),
        grid_spec=pltpu.PrefetchScalarGridSpec(
            num_scalar_prefetch=0,
            grid=(steps,),
            in_specs=in_specs,
            out_specs=pl.BlockSpec((M, L), lambda n: (n, 0)),
        ),
        compiler_params=pltpu.CompilerParams(
            dimension_semantics=("parallel",),
            vmem_limit_bytes=32 * 1024 * 1024,
        ),
    )(*inputs)

    out = out.reshape(N, Ho, Wo, Cout)                      # lane-dense -> NHWC
    return jnp.transpose(out, (0, 3, 1, 2))                 # NHWC -> NCHW


# --------------------------------------------------------------------------------
# Deterministic parameter init (synthetic; BatchNorms folded to eval-mode scale/bias)
# --------------------------------------------------------------------------------
def init_params(key, Cin, Cout, stride, use_se, reduction=8, eps=1e-5):
    ks = jax.random.split(key, 10)

    def conv_w(k, shape, fan_in):
        return jax.random.normal(k, shape, jnp.float32) / np.sqrt(fan_in)

    def bn_fold(k):
        kg, kb, km, kv = jax.random.split(k, 4)
        gamma = jax.random.uniform(kg, (Cout,), jnp.float32, 0.5, 1.5)
        beta = 0.1 * jax.random.normal(kb, (Cout,), jnp.float32)
        rmean = 0.1 * jax.random.normal(km, (Cout,), jnp.float32)
        rvar = jax.random.uniform(kv, (Cout,), jnp.float32, 0.5, 1.5)
        scale = gamma / jnp.sqrt(rvar + eps)
        return scale, beta - rmean * scale

    p = {}
    p["w1"] = conv_w(ks[0], (3, 3, Cin, Cout), 9 * Cin)         # HWIO
    p["bn1_scale"], p["bn1_bias"] = bn_fold(ks[1])
    p["w2"] = conv_w(ks[2], (3, 3, Cout, Cout), 9 * Cout)
    p["bn2_scale"], p["bn2_bias"] = bn_fold(ks[3])
    p["gn_gamma"] = jax.random.uniform(ks[4], (Cout,), jnp.float32, 0.5, 1.5)
    p["gn_beta"] = 0.1 * jax.random.normal(ks[5], (Cout,), jnp.float32)
    hid = max(1, Cout // reduction)
    p["se_w1"] = conv_w(ks[6], (Cout, hid), Cout)
    p["se_b1"] = jnp.zeros((hid,), jnp.float32)
    p["se_w2"] = conv_w(ks[7], (hid, Cout), hid)
    p["se_b2"] = jnp.zeros((Cout,), jnp.float32)
    if stride != 1 or Cin != Cout:
        p["wsc"] = conv_w(ks[8], (Cin, Cout), Cin)              # 1x1 conv
        p["bnsc_scale"], p["bnsc_bias"] = bn_fold(ks[9])
    return p


# --------------------------------------------------------------------------------
# Pure-JAX reference (f32, HIGHEST precision) for the correctness self-check
# --------------------------------------------------------------------------------
def reference_forward(x_nchw, params, stride, use_se, G):
    x = jnp.transpose(x_nchw, (0, 2, 3, 1)).astype(jnp.float32)      # NHWC

    def conv(inp, w, s, pad):
        return lax.conv_general_dilated(
            inp, w, window_strides=(s, s), padding=pad,
            dimension_numbers=("NHWC", "HWIO", "NHWC"),
            precision=lax.Precision.HIGHEST)

    def bn(y, scale, bias):
        return y * scale.reshape(1, 1, 1, -1) + bias.reshape(1, 1, 1, -1)

    def gn(y, gamma, beta, eps=1e-5):
        N, H, W, C = y.shape
        yg = y.reshape(N, H, W, G, C // G)
        m = yg.mean(axis=(1, 2, 4), keepdims=True)
        v = yg.var(axis=(1, 2, 4), keepdims=True)
        yg = (yg - m) / jnp.sqrt(v + eps)
        return yg.reshape(N, H, W, C) * gamma.reshape(1, 1, 1, C) + beta.reshape(1, 1, 1, C)

    out = conv(x, params["w1"], stride, ((1, 1), (1, 1)))
    out = bn(out, params["bn1_scale"], params["bn1_bias"])
    out = gn(out, params["gn_gamma"], params["gn_beta"])
    out = jnp.maximum(out, 0.0)
    out = conv(out, params["w2"], 1, ((1, 1), (1, 1)))
    out = bn(out, params["bn2_scale"], params["bn2_bias"])
    out = gn(out, params["gn_gamma"], params["gn_beta"])
    if use_se:
        s = out.mean(axis=(1, 2))
        h = jnp.maximum(s @ params["se_w1"] + params["se_b1"], 0.0)
        e = jax.nn.sigmoid(h @ params["se_w2"] + params["se_b2"])
        out = out * e[:, None, None, :]
    if "wsc" in params:
        w = params["wsc"].reshape(1, 1, *params["wsc"].shape)
        sc = conv(x, w, stride, "VALID")
        sc = bn(sc, params["bnsc_scale"], params["bnsc_bias"])
    else:
        sc = x
    out = jnp.maximum(out + sc, 0.0)
    return jnp.transpose(out, (0, 3, 1, 2))


if __name__ == "__main__":
    key = jax.random.PRNGKey(0)
    N, H, W = 4, 16, 16
    configs = [
        # (Cin, Cout, stride, use_se, images_per_step)
        (4, 8, 1, True, None),   # projection (1x1 conv + BN) shortcut, batch-folded path
        (8, 8, 1, True, None),   # identity shortcut + NaN-fallback branch, batch-folded path
        (8, 8, 1, True, 1),      # identity path, one image per grid step (nb == 1 path)
    ]

    for idx, (Cin, Cout, stride, use_se, ips) in enumerate(configs):
        kxi, kpi = jax.random.split(jax.random.fold_in(key, idx))
        x = jax.random.normal(kxi, (N, Cin, H, W), jnp.float32)
        params = init_params(kpi, Cin, Cout, stride, use_se)
        G = calculate_groups_for_channels(Cout)
        ref = np.asarray(reference_forward(x, params, stride, use_se, G))
        Ho = (H - 1) // stride + 1
        Wo = (W - 1) // stride + 1

        # structural check: f32 MXU operands -> tight tolerance
        out_f32 = jax.block_until_ready(
            cnn_block_forward(x, params, stride=stride, use_se=use_se,
                              conv_dtype=jnp.float32, images_per_step=ips))
        np.testing.assert_allclose(np.asarray(out_f32), ref, rtol=5e-3, atol=5e-3)

        # performance mode: bf16 MXU operands (f32 accumulate) -> looser tolerance
        out_bf16 = jax.block_until_ready(
            cnn_block_forward(x, params, stride=stride, use_se=use_se,
                              conv_dtype=jnp.bfloat16, images_per_step=ips))
        np.testing.assert_allclose(np.asarray(out_bf16), ref, rtol=5e-2, atol=5e-2)

        assert out_f32.shape == (N, Cout, Ho, Wo)
        assert out_bf16.shape == (N, Cout, Ho, Wo)

    print("KERNEL_OK")
</pallas_src>

<mosaic_0001>
module attributes {stable_mosaic.version = 11 : i64} {
  func.func @kernel(%arg0: i32, %arg1: memref<32x216xf32, #tpu.memory_space<vmem>>, %arg2: memref<216x128xf32, #tpu.memory_space<vmem>>, %arg3: memref<1x128xf32, #tpu.memory_space<vmem>>, %arg4: memref<1x128xf32, #tpu.memory_space<vmem>>, %arg5: memref<384x128xf32, #tpu.memory_space<vmem>>, %arg6: memref<1x128xf32, #tpu.memory_space<vmem>>, %arg7: memref<1x128xf32, #tpu.memory_space<vmem>>, %arg8: memref<1x128xf32, #tpu.memory_space<vmem>>, %arg9: memref<1x128xf32, #tpu.memory_space<vmem>>, %arg10: memref<128x8xf32, #tpu.memory_space<vmem>>, %arg11: memref<8x128xf32, #tpu.memory_space<vmem>>, %arg12: memref<2x32xf32, #tpu.memory_space<vmem>>, %arg13: memref<32x2xf32, #tpu.memory_space<vmem>>, %arg14: memref<32x1xf32, #tpu.memory_space<vmem>>, %arg15: memref<32x1xf32, #tpu.memory_space<vmem>>, %arg16: memref<128x1xf32, #tpu.memory_space<vmem>>, %arg17: memref<1x1xf32, #tpu.memory_space<vmem>>, %arg18: memref<1x128xf32, #tpu.memory_space<vmem>>, %arg19: memref<1x128xf32, #tpu.memory_space<vmem>>, %arg20: memref<216x128xf32, #tpu.memory_space<vmem>>, %arg21: memref<1x128xf32, #tpu.memory_space<vmem>>, %arg22: memref<1x128xf32, #tpu.memory_space<vmem>>, %arg23: memref<32x128xf32, #tpu.memory_space<vmem>>) attributes {dimension_semantics = [#tpu.dimension_semantics<parallel>], iteration_bounds = array<i64: 2>, scalar_prefetch = 0 : i64, scratch_operands = 0 : i64, tpu.core_type = #tpu.core_type<tc>, window_params = [{transform_indices = @transform_0, window_bounds = array<i64: 32, 216>}, {pipeline_mode = #tpu.pipeline_mode<synchronous>, transform_indices = @transform_1, window_bounds = array<i64: 216, 128>}, {pipeline_mode = #tpu.pipeline_mode<synchronous>, transform_indices = @transform_2, window_bounds = array<i64: 1, 128>}, {pipeline_mode = #tpu.pipeline_mode<synchronous>, transform_indices = @transform_3, window_bounds = array<i64: 1, 128>}, {pipeline_mode = #tpu.pipeline_mode<synchronous>, transform_indices = @transform_4, window_bounds = array<i64: 384, 128>}, {pipeline_mode = #tpu.pipeline_mode<synchronous>, transform_indices = @transform_5, window_bounds = array<i64: 1, 128>}, {pipeline_mode = #tpu.pipeline_mode<synchronous>, transform_indices = @transform_6, window_bounds = array<i64: 1, 128>}, {pipeline_mode = #tpu.pipeline_mode<synchronous>, transform_indices = @transform_7, window_bounds = array<i64: 1, 128>}, {pipeline_mode = #tpu.pipeline_mode<synchronous>, transform_indices = @transform_8, window_bounds = array<i64: 1, 128>}, {pipeline_mode = #tpu.pipeline_mode<synchronous>, transform_indices = @transform_9, window_bounds = array<i64: 128, 8>}, {pipeline_mode = #tpu.pipeline_mode<synchronous>, transform_indices = @transform_10, window_bounds = array<i64: 8, 128>}, {pipeline_mode = #tpu.pipeline_mode<synchronous>, transform_indices = @transform_11, window_bounds = array<i64: 2, 32>}, {pipeline_mode = #tpu.pipeline_mode<synchronous>, transform_indices = @transform_12, window_bounds = array<i64: 32, 2>}, {pipeline_mode = #tpu.pipeline_mode<synchronous>, transform_indices = @transform_13, window_bounds = array<i64: 32, 1>}, {pipeline_mode = #tpu.pipeline_mode<synchronous>, transform_indices = @transform_14, window_bounds = array<i64: 32, 1>}, {pipeline_mode = #tpu.pipeline_mode<synchronous>, transform_indices = @transform_15, window_bounds = array<i64: 128, 1>}, {pipeline_mode = #tpu.pipeline_mode<synchronous>, transform_indices = @transform_16, window_bounds = array<i64: 1, 1>}, {pipeline_mode = #tpu.pipeline_mode<synchronous>, transform_indices = @transform_17, window_bounds = array<i64: 1, 128>}, {pipeline_mode = #tpu.pipeline_mode<synchronous>, transform_indices = @transform_18, window_bounds = array<i64: 1, 128>}, {pipeline_mode = #tpu.pipeline_mode<synchronous>, transform_indices = @transform_19, window_bounds = array<i64: 216, 128>}, {pipeline_mode = #tpu.pipeline_mode<synchronous>, transform_indices = @transform_20, window_bounds = array<i64: 1, 128>}, {pipeline_mode = #tpu.pipeline_mode<synchronous>, transform_indices = @transform_21, window_bounds = array<i64: 1, 128>}, {transform_indices = @transform_22, window_bounds = array<i64: 32, 128>}]} {
    %c0 = arith.constant 0 : index
    %c0_0 = arith.constant 0 : index
    %0 = vector.load %arg8[%c0, %c0_0] : memref<1x128xf32, #tpu.memory_space<vmem>>, vector<1x128xf32>
    %c0_1 = arith.constant 0 : index
    %c0_2 = arith.constant 0 : index
    %1 = vector.load %arg9[%c0_1, %c0_2] : memref<1x128xf32, #tpu.memory_space<vmem>>, vector<1x128xf32>
    %c0_3 = arith.constant 0 : index
    %c0_4 = arith.constant 0 : index
    %2 = vector.load %arg10[%c0_3, %c0_4] : memref<128x8xf32, #tpu.memory_space<vmem>>, vector<128x8xf32>
    %c0_5 = arith.constant 0 : index
    %c0_6 = arith.constant 0 : index
    %3 = vector.load %arg11[%c0_5, %c0_6] : memref<8x128xf32, #tpu.memory_space<vmem>>, vector<8x128xf32>
    %c0_7 = arith.constant 0 : index
    %c0_8 = arith.constant 0 : index
    %4 = vector.load %arg12[%c0_7, %c0_8] : memref<2x32xf32, #tpu.memory_space<vmem>>, vector<2x32xf32>
    %c0_9 = arith.constant 0 : index
    %c0_10 = arith.constant 0 : index
    %5 = vector.load %arg13[%c0_9, %c0_10] : memref<32x2xf32, #tpu.memory_space<vmem>>, vector<32x2xf32>
    %c0_11 = arith.constant 0 : index
    %c0_12 = arith.constant 0 : index
    %6 = vector.load %arg1[%c0_11, %c0_12] : memref<32x216xf32, #tpu.memory_space<vmem>>, vector<32x216xf32>
    %c0_13 = arith.constant 0 : index
    %c0_14 = arith.constant 0 : index
    %7 = vector.load %arg2[%c0_13, %c0_14] : memref<216x128xf32, #tpu.memory_space<vmem>>, vector<216x128xf32>
    %cst = arith.constant dense<0.000000e+00> : vector<32x128xf32>
    %8 = tpu.matmul %6, %7, %cst {dimension_numbers = #tpu.dot_dimension_numbers<[1], [0], [0], [1], [0, 0, 1, 1], [], []>} : vector<32x216xf32>, vector<216x128xf32>, vector<32x128xf32> -> vector<32x128xf32>
    %c0_15 = arith.constant 0 : index
    %c0_16 = arith.constant 0 : index
    %9 = vector.load %arg3[%c0_15, %c0_16] : memref<1x128xf32, #tpu.memory_space<vmem>>, vector<1x128xf32>
    %c0_17 = arith.constant 0 : index
    %c0_18 = arith.constant 0 : index
    %10 = vector.load %arg4[%c0_17, %c0_18] : memref<1x128xf32, #tpu.memory_space<vmem>>, vector<1x128xf32>
    %cst_19 = arith.constant dense<0.000000e+00> : vector<2x128xf32>
    %11 = tpu.matmul %4, %8, %cst_19 {dimension_numbers = #tpu.dot_dimension_numbers<[1], [0], [0], [1], [0, 0, 1, 1], [], []>} : vector<2x32xf32>, vector<32x128xf32>, vector<2x128xf32> -> vector<2x128xf32>
    %12 = arith.mulf %8, %8 : vector<32x128xf32>
    %cst_20 = arith.constant dense<0.000000e+00> : vector<2x128xf32>
    %13 = tpu.matmul %4, %12, %cst_20 {dimension_numbers = #tpu.dot_dimension_numbers<[1], [0], [0], [1], [0, 0, 1, 1], [], []>} : vector<2x32xf32>, vector<32x128xf32>, vector<2x128xf32> -> vector<2x128xf32>
    %14 = vector.broadcast %9 : vector<1x128xf32> to vector<2x128xf32>
    %15 = arith.mulf %14, %11 : vector<2x128xf32>
    %cst_21 = arith.constant 1.600000e+01 : f32
    %16 = vector.broadcast %cst_21 : f32 to vector<1x128xf32>
    %17 = arith.mulf %16, %10 : vector<1x128xf32>
    %18 = vector.broadcast %17 : vector<1x128xf32> to vector<2x128xf32>
    %19 = arith.addf %15, %18 : vector<2x128xf32>
    %20 = arith.mulf %9, %9 : vector<1x128xf32>
    %21 = vector.broadcast %20 : vector<1x128xf32> to vector<2x128xf32>
    %22 = arith.mulf %21, %13 : vector<2x128xf32>
    %cst_22 = arith.constant 2.000000e+00 : f32
    %23 = vector.broadcast %cst_22 : f32 to vector<1x128xf32>
    %24 = arith.mulf %23, %9 : vector<1x128xf32>
    %25 = arith.mulf %24, %10 : vector<1x128xf32>
    %26 = vector.broadcast %25 : vector<1x128xf32> to vector<2x128xf32>
    %27 = arith.mulf %26, %11 : vector<2x128xf32>
    %28 = arith.addf %22, %27 : vector<2x128xf32>
    %29 = arith.mulf %10, %10 : vector<1x128xf32>
    %cst_23 = arith.constant 1.600000e+01 : f32
    %30 = vector.broadcast %cst_23 : f32 to vector<1x128xf32>
    %31 = arith.mulf %30, %29 : vector<1x128xf32>
    %32 = vector.broadcast %31 : vector<1x128xf32> to vector<2x128xf32>
    %33 = arith.addf %28, %32 : vector<2x128xf32>
    %34 = tpu.concatenate %19, %33 in 0 : vector<2x128xf32>, vector<2x128xf32> -> vector<4x128xf32>
    %cst_24 = arith.constant dense<0.000000e+00> : vector<4x8xf32>
    %35 = tpu.matmul %34, %2, %cst_24 {dimension_numbers = #tpu.dot_dimension_numbers<[1], [0], [0], [1], [0, 0, 1, 1], [], []>} : vector<4x128xf32>, vector<128x8xf32>, vector<4x8xf32> -> vector<4x8xf32>
    %cst_25 = arith.constant 3.906250e-03 : f32
    %36 = vector.broadcast %cst_25 : f32 to vector<4x8xf32>
    %37 = arith.mulf %35, %36 : vector<4x8xf32>
    %38 = vector.extract_strided_slice %37 {offsets = [0, 0], sizes = [2, 8], strides = [1, 1]} : vector<4x8xf32> to vector<2x8xf32>
    %39 = vector.extract_strided_slice %37 {offsets = [2, 0], sizes = [2, 8], strides = [1, 1]} : vector<4x8xf32> to vector<2x8xf32>
    %40 = arith.mulf %38, %38 : vector<2x8xf32>
    %41 = arith.subf %39, %40 : vector<2x8xf32>
    %cst_26 = arith.constant 0.000000e+00 : f32
    %42 = vector.broadcast %cst_26 : f32 to vector<2x8xf32>
    %43 = arith.maximumf %41, %42 : vector<2x8xf32>
    %cst_27 = arith.constant 9.99999974E-6 : f32
    %44 = vector.broadcast %cst_27 : f32 to vector<2x8xf32>
    %45 = arith.addf %43, %44 : vector<2x8xf32>
    %46 = math.rsqrt %45 : vector<2x8xf32>
    %47 = tpu.concatenate %38, %46 in 0 : vector<2x8xf32>, vector<2x8xf32> -> vector<4x8xf32>
    %cst_28 = arith.constant dense<0.000000e+00> : vector<4x128xf32>
    %48 = tpu.matmul %47, %3, %cst_28 {dimension_numbers = #tpu.dot_dimension_numbers<[1], [0], [0], [1], [0, 0, 1, 1], [], []>} : vector<4x8xf32>, vector<8x128xf32>, vector<4x128xf32> -> vector<4x128xf32>
    %49 = vector.extract_strided_slice %48 {offsets = [0, 0], sizes = [2, 128], strides = [1, 1]} : vector<4x128xf32> to vector<2x128xf32>
    %50 = vector.extract_strided_slice %48 {offsets = [2, 0], sizes = [2, 128], strides = [1, 1]} : vector<4x128xf32> to vector<2x128xf32>
    %51 = vector.broadcast %9 : vector<1x128xf32> to vector<2x128xf32>
    %52 = arith.mulf %51, %50 : vector<2x128xf32>
    %53 = vector.broadcast %0 : vector<1x128xf32> to vector<2x128xf32>
    %54 = arith.mulf %52, %53 : vector<2x128xf32>
    %55 = vector.broadcast %10 : vector<1x128xf32> to vector<2x128xf32>
    %56 = arith.subf %55, %49 : vector<2x128xf32>
    %57 = arith.mulf %56, %50 : vector<2x128xf32>
    %58 = vector.broadcast %0 : vector<1x128xf32> to vector<2x128xf32>
    %59 = arith.mulf %57, %58 : vector<2x128xf32>
    %60 = vector.broadcast %1 : vector<1x128xf32> to vector<2x128xf32>
    %61 = arith.addf %59, %60 : vector<2x128xf32>
    %62 = tpu.concatenate %54, %61 in 1 : vector<2x128xf32>, vector<2x128xf32> -> vector<2x256xf32>
    %cst_29 = arith.constant dense<0.000000e+00> : vector<32x256xf32>
    %63 = tpu.matmul %5, %62, %cst_29 {dimension_numbers = #tpu.dot_dimension_numbers<[1], [0], [0], [1], [0, 0, 1, 1], [], []>} : vector<32x2xf32>, vector<2x256xf32>, vector<32x256xf32> -> vector<32x256xf32>
    %64 = vector.extract_strided_slice %63 {offsets = [0, 0], sizes = [32, 128], strides = [1, 1]} : vector<32x256xf32> to vector<32x128xf32>
    %65 = arith.mulf %8, %64 : vector<32x128xf32>
    %66 = vector.extract_strided_slice %63 {offsets = [0, 128], sizes = [32, 128], strides = [1, 1]} : vector<32x256xf32> to vector<32x128xf32>
    %67 = arith.addf %65, %66 : vector<32x128xf32>
    %cst_30 = arith.constant 0.000000e+00 : f32
    %68 = vector.broadcast %cst_30 : f32 to vector<32x128xf32>
    %69 = arith.maximumf %67, %68 : vector<32x128xf32>
    %cst_31 = arith.constant 0.000000e+00 : f32
    %70 = vector.broadcast %cst_31 : f32 to vector<1x128xf32>
    %71 = vector.extract_strided_slice %69 {offsets = [0, 0], sizes = [31, 128], strides = [1, 1]} : vector<32x128xf32> to vector<31x128xf32>
    %72 = tpu.concatenate %70, %71 in 0 : vector<1x128xf32>, vector<31x128xf32> -> vector<32x128xf32>
    %73 = vector.extract_strided_slice %69 {offsets = [1, 0], sizes = [31, 128], strides = [1, 1]} : vector<32x128xf32> to vector<31x128xf32>
    %74 = tpu.concatenate %73, %70 in 0 : vector<31x128xf32>, vector<1x128xf32> -> vector<32x128xf32>
    %c0_32 = arith.constant 0 : index
    %c0_33 = arith.constant 0 : index
    %75 = vector.load %arg14[%c0_32, %c0_33] : memref<32x1xf32, #tpu.memory_space<vmem>>, vector<32x1xf32>
    %76 = vector.broadcast %75 : vector<32x1xf32> to vector<32x128xf32>
    %77 = arith.mulf %72, %76 : vector<32x128xf32>
    %c0_34 = arith.constant 0 : index
    %c0_35 = arith.constant 0 : index
    %78 = vector.load %arg15[%c0_34, %c0_35] : memref<32x1xf32, #tpu.memory_space<vmem>>, vector<32x1xf32>
    %79 = vector.broadcast %78 : vector<32x1xf32> to vector<32x128xf32>
    %80 = arith.mulf %74, %79 : vector<32x128xf32>
    %81 = tpu.concatenate %77, %69, %80 in 1 : vector<32x128xf32>, vector<32x128xf32>, vector<32x128xf32> -> vector<32x384xf32>
    %c0_36 = arith.constant 0 : index
    %c0_37 = arith.constant 0 : index
    %82 = vector.load %arg5[%c0_36, %c0_37] : memref<384x128xf32, #tpu.memory_space<vmem>>, vector<384x128xf32>
    %cst_38 = arith.constant dense<0.000000e+00> : vector<32x128xf32>
    %83 = tpu.matmul %81, %82, %cst_38 {dimension_numbers = #tpu.dot_dimension_numbers<[1], [0], [0], [1], [0, 0, 1, 1], [], []>} : vector<32x384xf32>, vector<384x128xf32>, vector<32x128xf32> -> vector<32x128xf32>
    %c0_39 = arith.constant 0 : index
    %c0_40 = arith.constant 0 : index
    %84 = vector.load %arg6[%c0_39, %c0_40] : memref<1x128xf32, #tpu.memory_space<vmem>>, vector<1x128xf32>
    %c0_41 = arith.constant 0 : index
    %c0_42 = arith.constant 0 : index
    %85 = vector.load %arg7[%c0_41, %c0_42] : memref<1x128xf32, #tpu.memory_space<vmem>>, vector<1x128xf32>
    %cst_43 = arith.constant dense<0.000000e+00> : vector<2x128xf32>
    %86 = tpu.matmul %4, %83, %cst_43 {dimension_numbers = #tpu.dot_dimension_numbers<[1], [0], [0], [1], [0, 0, 1, 1], [], []>} : vector<2x32xf32>, vector<32x128xf32>, vector<2x128xf32> -> vector<2x128xf32>
    %87 = arith.mulf %83, %83 : vector<32x128xf32>
    %cst_44 = arith.constant dense<0.000000e+00> : vector<2x128xf32>
    %88 = tpu.matmul %4, %87, %cst_44 {dimension_numbers = #tpu.dot_dimension_numbers<[1], [0], [0], [1], [0, 0, 1, 1], [], []>} : vector<2x32xf32>, vector<32x128xf32>, vector<2x128xf32> -> vector<2x128xf32>
    %89 = vector.broadcast %84 : vector<1x128xf32> to vector<2x128xf32>
    %90 = arith.mulf %89, %86 : vector<2x128xf32>
    %cst_45 = arith.constant 1.600000e+01 : f32
    %91 = vector.broadcast %cst_45 : f32 to vector<1x128xf32>
    %92 = arith.mulf %91, %85 : vector<1x128xf32>
    %93 = vector.broadcast %92 : vector<1x128xf32> to vector<2x128xf32>
    %94 = arith.addf %90, %93 : vector<2x128xf32>
    %95 = arith.mulf %84, %84 : vector<1x128xf32>
    %96 = vector.broadcast %95 : vector<1x128xf32> to vector<2x128xf32>
    %97 = arith.mulf %96, %88 : vector<2x128xf32>
    %cst_46 = arith.constant 2.000000e+00 : f32
    %98 = vector.broadcast %cst_46 : f32 to vector<1x128xf32>
    %99 = arith.mulf %98, %84 : vector<1x128xf32>
    %100 = arith.mulf %99, %85 : vector<1x128xf32>
    %101 = vector.broadcast %100 : vector<1x128xf32> to vector<2x128xf32>
    %102 = arith.mulf %101, %86 : vector<2x128xf32>
    %103 = arith.addf %97, %102 : vector<2x128xf32>
    %104 = arith.mulf %85, %85 : vector<1x128xf32>
    %cst_47 = arith.constant 1.600000e+01 : f32
    %105 = vector.broadcast %cst_47 : f32 to vector<1x128xf32>
    %106 = arith.mulf %105, %104 : vector<1x128xf32>
    %107 = vector.broadcast %106 : vector<1x128xf32> to vector<2x128xf32>
    %108 = arith.addf %103, %107 : vector<2x128xf32>
    %109 = tpu.concatenate %94, %108 in 0 : vector<2x128xf32>, vector<2x128xf32> -> vector<4x128xf32>
    %cst_48 = arith.constant dense<0.000000e+00> : vector<4x8xf32>
    %110 = tpu.matmul %109, %2, %cst_48 {dimension_numbers = #tpu.dot_dimension_numbers<[1], [0], [0], [1], [0, 0, 1, 1], [], []>} : vector<4x128xf32>, vector<128x8xf32>, vector<4x8xf32> -> vector<4x8xf32>
    %cst_49 = arith.constant 3.906250e-03 : f32
    %111 = vector.broadcast %cst_49 : f32 to vector<4x8xf32>
    %112 = arith.mulf %110, %111 : vector<4x8xf32>
    %113 = vector.extract_strided_slice %112 {offsets = [0, 0], sizes = [2, 8], strides = [1, 1]} : vector<4x8xf32> to vector<2x8xf32>
    %114 = vector.extract_strided_slice %112 {offsets = [2, 0], sizes = [2, 8], strides = [1, 1]} : vector<4x8xf32> to vector<2x8xf32>
    %115 = arith.mulf %113, %113 : vector<2x8xf32>
    %116 = arith.subf %114, %115 : vector<2x8xf32>
    %cst_50 = arith.constant 0.000000e+00 : f32
    %117 = vector.broadcast %cst_50 : f32 to vector<2x8xf32>
    %118 = arith.maximumf %116, %117 : vector<2x8xf32>
    %cst_51 = arith.constant 9.99999974E-6 : f32
    %119 = vector.broadcast %cst_51 : f32 to vector<2x8xf32>
    %120 = arith.addf %118, %119 : vector<2x8xf32>
    %121 = math.rsqrt %120 : vector<2x8xf32>
    %122 = tpu.concatenate %113, %121 in 0 : vector<2x8xf32>, vector<2x8xf32> -> vector<4x8xf32>
    %cst_52 = arith.constant dense<0.000000e+00> : vector<4x128xf32>
    %123 = tpu.matmul %122, %3, %cst_52 {dimension_numbers = #tpu.dot_dimension_numbers<[1], [0], [0], [1], [0, 0, 1, 1], [], []>} : vector<4x8xf32>, vector<8x128xf32>, vector<4x128xf32> -> vector<4x128xf32>
    %124 = vector.extract_strided_slice %123 {offsets = [0, 0], sizes = [2, 128], strides = [1, 1]} : vector<4x128xf32> to vector<2x128xf32>
    %125 = vector.extract_strided_slice %123 {offsets = [2, 0], sizes = [2, 128], strides = [1, 1]} : vector<4x128xf32> to vector<2x128xf32>
    %126 = vector.broadcast %84 : vector<1x128xf32> to vector<2x128xf32>
    %127 = arith.mulf %126, %125 : vector<2x128xf32>
    %128 = vector.broadcast %0 : vector<1x128xf32> to vector<2x128xf32>
    %129 = arith.mulf %127, %128 : vector<2x128xf32>
    %130 = vector.broadcast %85 : vector<1x128xf32> to vector<2x128xf32>
    %131 = arith.subf %130, %124 : vector<2x128xf32>
    %132 = arith.mulf %131, %125 : vector<2x128xf32>
    %133 = vector.broadcast %0 : vector<1x128xf32> to vector<2x128xf32>
    %134 = arith.mulf %132, %133 : vector<2x128xf32>
    %135 = vector.broadcast %1 : vector<1x128xf32> to vector<2x128xf32>
    %136 = arith.addf %134, %135 : vector<2x128xf32>
    %137 = arith.mulf %129, %86 : vector<2x128xf32>
    %cst_53 = arith.constant 1.600000e+01 : f32
    %138 = vector.broadcast %cst_53 : f32 to vector<2x128xf32>
    %139 = arith.mulf %138, %136 : vector<2x128xf32>
    %140 = arith.addf %137, %139 : vector<2x128xf32>
    %c0_54 = arith.constant 0 : index
    %c0_55 = arith.constant 0 : index
    %141 = vector.load %arg16[%c0_54, %c0_55] : memref<128x1xf32, #tpu.memory_space<vmem>>, vector<128x1xf32>
    %cst_56 = arith.constant dense<0.000000e+00> : vector<2x1xf32>
    %142 = tpu.matmul %140, %141, %cst_56 {dimension_numbers = #tpu.dot_dimension_numbers<[1], [0], [0], [1], [0, 0, 1, 1], [], []>} : vector<2x128xf32>, vector<128x1xf32>, vector<2x1xf32> -> vector<2x1xf32>
    %c0_57 = arith.constant 0 : index
    %c0_58 = arith.constant 0 : index
    %143 = vector.load %arg17[%c0_57, %c0_58] : memref<1x1xf32, #tpu.memory_space<vmem>>, vector<1x1xf32>
    %144 = vector.broadcast %143 : vector<1x1xf32> to vector<2x1xf32>
    %145 = arith.addf %142, %144 : vector<2x1xf32>
    %cst_59 = arith.constant 0.000000e+00 : f32
    %146 = vector.broadcast %cst_59 : f32 to vector<2x1xf32>
    %147 = arith.maximumf %145, %146 : vector<2x1xf32>
    %c0_60 = arith.constant 0 : index
    %c0_61 = arith.constant 0 : index
    %148 = vector.load %arg18[%c0_60, %c0_61] : memref<1x128xf32, #tpu.memory_space<vmem>>, vector<1x128xf32>
    %cst_62 = arith.constant dense<0.000000e+00> : vector<2x128xf32>
    %149 = tpu.matmul %147, %148, %cst_62 {dimension_numbers = #tpu.dot_dimension_numbers<[1], [0], [0], [1], [0, 0, 1, 1], [], []>} : vector<2x1xf32>, vector<1x128xf32>, vector<2x128xf32> -> vector<2x128xf32>
    %c0_63 = arith.constant 0 : index
    %c0_64 = arith.constant 0 : index
    %150 = vector.load %arg19[%c0_63, %c0_64] : memref<1x128xf32, #tpu.memory_space<vmem>>, vector<1x128xf32>
    %151 = vector.broadcast %150 : vector<1x128xf32> to vector<2x128xf32>
    %152 = arith.addf %149, %151 : vector<2x128xf32>
    %153 = arith.negf %152 : vector<2x128xf32>
    %154 = math.exp %153 : vector<2x128xf32>
    %cst_65 = arith.constant 1.000000e+00 : f32
    %155 = vector.broadcast %cst_65 : f32 to vector<2x128xf32>
    %156 = arith.addf %155, %154 : vector<2x128xf32>
    %157 = arith.divf %155, %156 : vector<2x128xf32>
    %158 = arith.mulf %129, %157 : vector<2x128xf32>
    %159 = arith.mulf %136, %157 : vector<2x128xf32>
    %160 = tpu.concatenate %158, %159 in 1 : vector<2x128xf32>, vector<2x128xf32> -> vector<2x256xf32>
    %cst_66 = arith.constant dense<0.000000e+00> : vector<32x256xf32>
    %161 = tpu.matmul %5, %160, %cst_66 {dimension_numbers = #tpu.dot_dimension_numbers<[1], [0], [0], [1], [0, 0, 1, 1], [], []>} : vector<32x2xf32>, vector<2x256xf32>, vector<32x256xf32> -> vector<32x256xf32>
    %162 = vector.extract_strided_slice %161 {offsets = [0, 0], sizes = [32, 128], strides = [1, 1]} : vector<32x256xf32> to vector<32x128xf32>
    %163 = arith.mulf %83, %162 : vector<32x128xf32>
    %164 = vector.extract_strided_slice %161 {offsets = [0, 128], sizes = [32, 128], strides = [1, 1]} : vector<32x256xf32> to vector<32x128xf32>
    %165 = arith.addf %163, %164 : vector<32x128xf32>
    %c0_67 = arith.constant 0 : index
    %c0_68 = arith.constant 0 : index
    %166 = vector.load %arg20[%c0_67, %c0_68] : memref<216x128xf32, #tpu.memory_space<vmem>>, vector<216x128xf32>
    %cst_69 = arith.constant dense<0.000000e+00> : vector<32x128xf32>
    %167 = tpu.matmul %6, %166, %cst_69 {dimension_numbers = #tpu.dot_dimension_numbers<[1], [0], [0], [1], [0, 0, 1, 1], [], []>} : vector<32x216xf32>, vector<216x128xf32>, vector<32x128xf32> -> vector<32x128xf32>
    %c0_70 = arith.constant 0 : index
    %c0_71 = arith.constant 0 : index
    %168 = vector.load %arg21[%c0_70, %c0_71] : memref<1x128xf32, #tpu.memory_space<vmem>>, vector<1x128xf32>
    %169 = vector.broadcast %168 : vector<1x128xf32> to vector<32x128xf32>
    %170 = arith.mulf %167, %169 : vector<32x128xf32>
    %c0_72 = arith.constant 0 : index
    %c0_73 = arith.constant 0 : index
    %171 = vector.load %arg22[%c0_72, %c0_73] : memref<1x128xf32, #tpu.memory_space<vmem>>, vector<1x128xf32>
    %172 = vector.broadcast %171 : vector<1x128xf32> to vector<32x128xf32>
    %173 = arith.addf %170, %172 : vector<32x128xf32>
    %174 = arith.addf %165, %173 : vector<32x128xf32>
    %cst_74 = arith.constant 0.000000e+00 : f32
    %175 = vector.broadcast %cst_74 : f32 to vector<32x128xf32>
    %176 = arith.maximumf %174, %175 : vector<32x128xf32>
    %c0_75 = arith.constant 0 : index
    %c0_76 = arith.constant 0 : index
    %177 = vector.load %arg23[%c0_75, %c0_76] : memref<32x128xf32, #tpu.memory_space<vmem>>, vector<32x128xf32>
    tpu.vector_store %arg23[%c0_75, %c0_76], %176 {strides = array<i32>} : memref<32x128xf32, #tpu.memory_space<vmem>>, vector<32x128xf32>,
    return
  }
  func.func @transform_0(%arg0: i32) -> (i32, i32) {
    %c0_i32 = arith.constant 0 : i32
    %c0_i32_0 = arith.constant 0 : i32
    return %arg0, %c0_i32 : i32, i32
  }
  func.func @transform_1(%arg0: i32) -> (i32, i32) {
    %c0_i32 = arith.constant 0 : i32
    %c0_i32_0 = arith.constant 0 : i32
    %c0_i32_1 = arith.constant 0 : i32
    return %c0_i32, %c0_i32_0 : i32, i32
  }
  func.func @transform_2(%arg0: i32) -> (i32, i32) {
    %c0_i32 = arith.constant 0 : i32
    %c0_i32_0 = arith.constant 0 : i32
    %c0_i32_1 = arith.constant 0 : i32
    return %c0_i32, %c0_i32_0 : i32, i32
  }
  func.func @transform_3(%arg0: i32) -> (i32, i32) {
    %c0_i32 = arith.constant 0 : i32
    %c0_i32_0 = arith.constant 0 : i32
    %c0_i32_1 = arith.constant 0 : i32
    return %c0_i32, %c0_i32_0 : i32, i32
  }
  func.func @transform_4(%arg0: i32) -> (i32, i32) {
    %c0_i32 = arith.constant 0 : i32
    %c0_i32_0 = arith.constant 0 : i32
    %c0_i32_1 = arith.constant 0 : i32
    return %c0_i32, %c0_i32_0 : i32, i32
  }
  func.func @transform_5(%arg0: i32) -> (i32, i32) {
    %c0_i32 = arith.constant 0 : i32
    %c0_i32_0 = arith.constant 0 : i32
    %c0_i32_1 = arith.constant 0 : i32
    return %c0_i32, %c0_i32_0 : i32, i32
  }
  func.func @transform_6(%arg0: i32) -> (i32, i32) {
    %c0_i32 = arith.constant 0 : i32
    %c0_i32_0 = arith.constant 0 : i32
    %c0_i32_1 = arith.constant 0 : i32
    return %c0_i32, %c0_i32_0 : i32, i32
  }
  func.func @transform_7(%arg0: i32) -> (i32, i32) {
    %c0_i32 = arith.constant 0 : i32
    %c0_i32_0 = arith.constant 0 : i32
    %c0_i32_1 = arith.constant 0 : i32
    return %c0_i32, %c0_i32_0 : i32, i32
  }
  func.func @transform_8(%arg0: i32) -> (i32, i32) {
    %c0_i32 = arith.constant 0 : i32
    %c0_i32_0 = arith.constant 0 : i32
    %c0_i32_1 = arith.constant 0 : i32
    return %c0_i32, %c0_i32_0 : i32, i32
  }
  func.func @transform_9(%arg0: i32) -> (i32, i32) {
    %c0_i32 = arith.constant 0 : i32
    %c0_i32_0 = arith.constant 0 : i32
    %c0_i32_1 = arith.constant 0 : i32
    return %c0_i32, %c0_i32_0 : i32, i32
  }
  func.func @transform_10(%arg0: i32) -> (i32, i32) {
    %c0_i32 = arith.constant 0 : i32
    %c0_i32_0 = arith.constant 0 : i32
    %c0_i32_1 = arith.constant 0 : i32
    return %c0_i32, %c0_i32_0 : i32, i32
  }
  func.func @transform_11(%arg0: i32) -> (i32, i32) {
    %c0_i32 = arith.constant 0 : i32
    %c0_i32_0 = arith.constant 0 : i32
    %c0_i32_1 = arith.constant 0 : i32
    return %c0_i32, %c0_i32_0 : i32, i32
  }
  func.func @transform_12(%arg0: i32) -> (i32, i32) {
    %c0_i32 = arith.constant 0 : i32
    %c0_i32_0 = arith.constant 0 : i32
    %c0_i32_1 = arith.constant 0 : i32
    return %c0_i32, %c0_i32_0 : i32, i32
  }
  func.func @transform_13(%arg0: i32) -> (i32, i32) {
    %c0_i32 = arith.constant 0 : i32
    %c0_i32_0 = arith.constant 0 : i32
    %c0_i32_1 = arith.constant 0 : i32
    return %c0_i32, %c0_i32_0 : i32, i32
  }
  func.func @transform_14(%arg0: i32) -> (i32, i32) {
    %c0_i32 = arith.constant 0 : i32
    %c0_i32_0 = arith.constant 0 : i32
    %c0_i32_1 = arith.constant 0 : i32
    return %c0_i32, %c0_i32_0 : i32, i32
  }
  func.func @transform_15(%arg0: i32) -> (i32, i32) {
    %c0_i32 = arith.constant 0 : i32
    %c0_i32_0 = arith.constant 0 : i32
    %c0_i32_1 = arith.constant 0 : i32
    return %c0_i32, %c0_i32_0 : i32, i32
  }
  func.func @transform_16(%arg0: i32) -> (i32, i32) {
    %c0_i32 = arith.constant 0 : i32
    %c0_i32_0 = arith.constant 0 : i32
    %c0_i32_1 = arith.constant 0 : i32
    return %c0_i32, %c0_i32_0 : i32, i32
  }
  func.func @transform_17(%arg0: i32) -> (i32, i32) {
    %c0_i32 = arith.constant 0 : i32
    %c0_i32_0 = arith.constant 0 : i32
    %c0_i32_1 = arith.constant 0 : i32
    return %c0_i32, %c0_i32_0 : i32, i32
  }
  func.func @transform_18(%arg0: i32) -> (i32, i32) {
    %c0_i32 = arith.constant 0 : i32
    %c0_i32_0 = arith.constant 0 : i32
    %c0_i32_1 = arith.constant 0 : i32
    return %c0_i32, %c0_i32_0 : i32, i32
  }
  func.func @transform_19(%arg0: i32) -> (i32, i32) {
    %c0_i32 = arith.constant 0 : i32
    %c0_i32_0 = arith.constant 0 : i32
    %c0_i32_1 = arith.constant 0 : i32
    return %c0_i32, %c0_i32_0 : i32, i32
  }
  func.func @transform_20(%arg0: i32) -> (i32, i32) {
    %c0_i32 = arith.constant 0 : i32
    %c0_i32_0 = arith.constant 0 : i32
    %c0_i32_1 = arith.constant 0 : i32
    return %c0_i32, %c0_i32_0 : i32, i32
  }
  func.func @transform_21(%arg0: i32) -> (i32, i32) {
    %c0_i32 = arith.constant 0 : i32
    %c0_i32_0 = arith.constant 0 : i32
    %c0_i32_1 = arith.constant 0 : i32
    return %c0_i32, %c0_i32_0 : i32, i32
  }
  func.func @transform_22(%arg0: i32) -> (i32, i32) {
    %c0_i32 = arith.constant 0 : i32
    %c0_i32_0 = arith.constant 0 : i32
    return %arg0, %c0_i32 : i32, i32
  }
}

</mosaic_0001>

<bundles_post_ra>
// kernel: tpu_custom_call.1
= control target key start
LH: loop header
LB: loop body
LE: loop exit
PB: predicated region body
PF: predicated region fallthrough
CT: control target
= control target key end

     0   :  { %s3067_s0 = inlined_call_operand.hbm [shape: f32[64,216], index: 0, kind: input, shape index: {}]   ;;  %s3068_s1 = inlined_call_operand.vmem [shape: f32[216,128], index: 1, kind: input, shape index: {}]   ;;  %s3069_s2 = inlined_call_operand.vmem [shape: f32[1,128], index: 2, kind: input, shape index: {}]   ;;  %s3070_s3 = inlined_call_operand.vmem [shape: f32[1,128], index: 3, kind: input, shape index: {}]   ;;  %s3071_s4 = inlined_call_operand.hbm [shape: f32[384,128], index: 4, kind: input, shape index: {}]   ;;  %s3072_s5 = inlined_call_operand.vmem [shape: f32[1,128], index: 5, kind: input, shape index: {}]   ;;  %s3073_s6 = inlined_call_operand.vmem [shape: f32[1,128], index: 6, kind: input, shape index: {}]   ;;  %s3074_s7 = inlined_call_operand.vmem [shape: f32[1,128], index: 7, kind: input, shape index: {}]   ;;  %s3075_s8 = inlined_call_operand.vmem [shape: f32[1,128], index: 8, kind: input, shape index: {}]   ;;  %s3076_s9 = inlined_call_operand.vmem [shape: f32[128,8], index: 9, kind: input, shape index: {}]   ;;  %s3077_s10 = inlined_call_operand.vmem [shape: f32[8,128], index: 10, kind: input, shape index: {}]   ;;  %s3078_s11 = inlined_call_operand.vmem [shape: f32[2,32], index: 11, kind: input, shape index: {}]   ;;  %s3079_s12 = inlined_call_operand.vmem [shape: f32[32,2], index: 12, kind: input, shape index: {}]   ;;  %s3080_s13 = inlined_call_operand.vmem [shape: f32[32,1], index: 13, kind: input, shape index: {}]   ;;  %s3081_s14 = inlined_call_operand.vmem [shape: f32[32,1], index: 14, kind: input, shape index: {}]   ;;  %s3082_s15 = inlined_call_operand.vmem [shape: f32[128,1], index: 15, kind: input, shape index: {}]   ;;  %s3083_s16 = inlined_call_operand.<no memory space> [shape: f32[1,1], index: 16, kind: input, shape index: {}]   ;;  %s3084_s17 = inlined_call_operand.vmem [shape: f32[1,128], index: 17, kind: input, shape index: {}]   ;;  %s3085_s18 = inlined_call_operand.vmem [shape: f32[1,128], index: 18, kind: input, shape index: {}]   ;;  %s3086_s19 = inlined_call_operand.hbm [shape: f32[216,128], index: 19, kind: input, shape index: {}]   ;;  %s3087_s20 = inlined_call_operand.vmem [shape: f32[1,128], index: 20, kind: input, shape index: {}]   ;;  %s3088_s21 = inlined_call_operand.vmem [shape: f32[1,128], index: 21, kind: input, shape index: {}]   ;;  %s3089_s22 = inlined_call_operand.hbm [shape: f32[64,128], index: 22, kind: output, shape index: {}]  }
   0x1   :  { %3105 = sst [smem:[#allocation18_spill]] %s3067_s0  ;;  %v27_v0 = vstv %s3083_s16 }
   0x2   :  { %3106 = sst [smem:[#allocation19_spill]] %s3068_s1  ;;  %28 = vst [vmem:[#allocation2] sm:$0x1] %v27_v0 }
   0x3   :  { %3107 = sst [smem:[#allocation20_spill]] %s3069_s2 }
   0x4   :  { %3108 = sst [smem:[#allocation21_spill]] %s3070_s3 }
   0x5   :  { %3109 = sst [smem:[#allocation22_spill]] %s3071_s4 }
   0x6   :  { %3110 = sst [smem:[#allocation23_spill]] %s3072_s5 }
   0x7   :  { %3111 = sst [smem:[#allocation24_spill]] %s3073_s6 }
   0x8   :  { %3112 = sst [smem:[#allocation25_spill]] %s3074_s7 }
   0x9   :  { %3113 = sst [smem:[#allocation26_spill]] %s3075_s8 }
   0xa   :  { %3114 = sst [smem:[#allocation27_spill]] %s3086_s19 }
   0xb   :  { %3115 = sst [smem:[#allocation28_spill]] %s3087_s20 }
   0xc   :  { %3116 = sst [smem:[#allocation29_spill]] %s3088_s21 }
   0xd   :  { %3117 = sst [smem:[#allocation30_spill]] %s3089_s22 }
   0xe   :  { %29 = vsyncpa [#allocation4], 0 }
   0xf   :  { %31 = vsyncpa [#allocation4 + $0x1], 0 }
  0x10   :  { %32 = vsyncpa [#allocation7], 0 }
  0x11   :  { %33 = vsyncpa [#allocation5], 0 }
  0x12   :  { %35 = vsyncpa [#allocation5 + $0x1], 0  ;;  %s2384_s29 = smov 0   ;;  %s2386_s30 = smov 0  }
  0x13   :  { %s2388_s4 = smov 0   ;;  %s2390_s0 = smov 0  }
  0x14 LB: > { %3118 = sst [smem:[#allocation13_spill]] %s2243_s29  ;;  %s2405_s16 = sadd.s32 4294967295, %s2255_s0   ;;  %s2255_s0 = sphi %s2390_s0, %s3144_s0   ;;  %s2251_s4 = sphi %s2388_s4, %s3146_s4   ;;  %s2247_s30 = sphi %s2386_s30, %s3148_s30   ;;  %s2243_s29 = sphi %s2384_s29, %s3147_s29  }
  0x15   : > { %3119 = sst [smem:[#allocation14_spill]] %s2251_s4  ;;  %s1904_s23 = sadd.s32 4294967294, %s2255_s0  }
  0x16   : > { %p61_p0 = scmp.ne.s32.totalorder %s2247_s30, %s2243_s29  ;;  %p62_p1 = scmp.eq.s32.totalorder %s2405_s16, 0 }
  0x17   : > { %p526_p2 = scmp.eq.s32.totalorder %s2405_s16, 1  ;;  %p532_p3 = scmp.eq.s32.totalorder %s1904_s23, 1 }
  0x18   : > { %p2414_p4 = por %p62_p1, %p61_p0  ;;  %p1905_p5 = scmp.ge.s32.totalorder %s2255_s0, 1 }
  0x19   : > { %p2419_p6 = por %p532_p3, %p61_p0  ;;  %p539_p7 = scmp.lt.s32.totalorder %s2255_s0, 3 }
  0x1a   : > { %s3123_s25 = sld [smem:[#allocation22_spill]]  ;;  %s2257_s27 = smov [#allocation6]  }
  0x1b   : > { %s3121_s5 = scalar_select %p2419_p6, 1, 0 }
  0x1c   : > { %p2427_p8 = pnand %p1905_p5, %p539_p7  ;;  %s561_s3 = sshll.u32 %s2257_s27, 4  ;;  %s562_s3 = int_to_ptr.vmem [resolvable:$true] %s561_s3 }
  0x1d   : > { %3122 = sst [smem:[#allocation15_spill]] %s3121_s5  ;;  %s2258_s6 = smov 128  }
  0x1e   : > { %p2004_p9 = pneg %p2427_p8  ;;  %s3125_s19 = sld [smem:[#allocation27_spill]] }
  0x1f   : > { %s2260_s27 = smov [#allocation8]   ;;  %s2440_s29 = sadd.s32 1, %s2255_s0  }
  0x20   : > { %s559_s26 = sshll.u32 %s3123_s25, 4  ;;  %p2005_p10 = pnand %p2004_p9, %p62_p1  ;;  %s560_s26 = int_to_ptr.hbm [resolvable:$true] %s559_s26 }
  0x21   : > { %s2259_s25 = smov 8   ;;  %s617_s5 = sshll.u32 %s2260_s27, 4  ;;  %s618_s5 = int_to_ptr.vmem [resolvable:$true] %s617_s5 }
  0x22   : > { %2007 = dma.hbm_to_vmem [thread:$0]  (!%p2005_p10), %s560_s26, 6144, %s562_s3, [#allocation7], %s2258_s6, %s2258_s6, %s2259_s25  }
  0x23   : > { %3126 = sst [smem:[#allocation16_spill]] %s2440_s29  ;;  %s48_s22 = sadd.s32 1, %s2251_s4 }
  0x24   : > { %s615_s24 = sshll.u32 %s3125_s19, 4  ;;  %s45_s21 = ssub.s32 %s2255_s0, %s2440_s29  ;;  %s616_s24 = int_to_ptr.hbm [resolvable:$true] %s615_s24 }
  0x25   : > { %2010 = dma.hbm_to_vmem [thread:$0]  (!%p2005_p10), %s616_s24, 3456, %s618_s5, [#allocation7], %s2258_s6, %s2258_s6, %s2259_s25  }
  0x26   : > { %p55_p12 = scmp.ne.s32.totalorder %s2251_s4, %s2247_s30  ;;  %p46_p13 = scmp.eq.s32.totalorder %s45_s21, 0 }
  0x27   : > { %p56_p0 = scmp.eq.s32.totalorder %s2255_s0, 0  ;;  %p2021_p5 = scmp.lt.s32.totalorder %s2255_s0, 2 }
  0x28   : > { %p2450_p3 = por %p526_p2, %p55_p12  ;;  %s637_s3 = sand.u32 1, %s2251_s4  }
  0x29   : > { %s2456_s26 = scalar_select %p46_p13, %s2251_s4, %s48_s22  }
  0x2a   : > { %p57_p7 = por %p56_p0, %p55_p12  ;;  %s1909_s23 = sshll.u32 %s637_s3, 6 }
  0x2b   : > { %3128 = sst [smem:[#allocation17_spill]] %s2456_s26  ;;  %s1963_s5 = sshll.u32 %s2255_s0, 6 }
  0x2c   : > { %s3129_s25 = sld [smem:[#allocation18_spill]]  ;;  %s641_s19 = scalar_lea.vmem [#allocation3], %s1909_s23 }
  0x2d   : > { %s650_s29 = sshll.u32 %s641_s19, 4  ;;  %p2463_p2 = pnand %p2021_p5, %p57_p7  ;;  %s651_s29 = int_to_ptr.vmem [resolvable:$true] %s650_s29 }
  0x2e   : > { %s638_s22 = scalar_lea.sflag [#allocation4], %s637_s3 }
  0x2f   : > { %p2159_p10 = pneg %p2463_p2 }
  0x32   : > { %s647_s27 = scalar_lea.hbm %s3129_s25, %s1963_s5  ;;  %s2162_s19 = scalar_lea.hbm %s3129_s25, 128 }
  0x33   : > { %s648_s21 = sshll.u32 %s647_s27, 4  ;;  %s649_s21 = int_to_ptr.hbm [resolvable:$true] %s648_s21 }
  0x34   : > { %s2155_s26 = sshra.s32 %s649_s21, 4  ;;  %s2156_s26 = int_to_ptr.hbm [resolvable:$true] %s2155_s26 }
  0x35   : > { %s2157_s4 = scalar_lea.hbm %s2156_s26, 64  ;;  %p2163_p0 = scmp.lt.s32.totalorder %s2156_s26, %s3129_s25 }
  0x36   : > { %p2158_p9 = scmp.ne.s32.totalorder %s2156_s26, %s2157_s4  ;;  %p2164_p5 = scmp.lt.s32.totalorder %s2162_s19, %s2157_s4 }
  0x38   : > { %p2160_p12 = pnand %p2159_p10, %p2158_p9  ;;  %p2165_p7 = por %p2164_p5, %p2163_p0 }
  0x3a   : > { %p2161_p13 = pneg %p2160_p12 }
  0x3c   : > { %p2166_p11 = pnand %p2165_p7, %p2161_p13 }
  0x3e   : > { %2169 = shalt.err (!%p2166_p11)
}
  0x3f   : > { %s2261_s3 = smov 256   ;;  %s2262_s27 = smov 16  }
  0x40   : > { %2014 = dma.hbm_to_vmem [thread:$0]  (!%p2463_p2), %s649_s21, 1024, %s651_s29, %s638_s22, %s2261_s3, %s2261_s3, %s2262_s27  }
  0x41   : > { %662 = sbr.rel (%p2427_p8) target bundleno = 1944 (0x798), region = 108  ;;  %s2480_s5 = sand.u32 (!%p2427_p8), 1, %s2247_s30  }
  0x42   : > { %s1914_s23 = sshll.u32 (!%p2427_p8), %s2480_s5, 6  ;;  %s665_s26 = scalar_lea.sflag (!%p2427_p8), [#allocation4], %s2480_s5 }
  0x43   : > { %s2484_s4 = scalar_lea.vmem (!%p2427_p8), [#allocation3], %s1914_s23 }
  0x46   : > { %2230 = dma.done.wait (%p2414_p4), %s665_s26, 1024  }
  0x47   : > { %2232 = vsyncadd (%p2414_p4), %s665_s26, 4294966272 }
  0x48   : > { %2234 = dma.done.wait (%p62_p1), [#allocation7], 9600  }
  0x49   : > { %2236 = vsyncadd (%p62_p1), [#allocation7], 4294957696  ;;  %s3131_s2 = sld [smem:[#allocation19_spill]]  ;;  %v767_v24 = vld [vmem:[%s2484_s4 + $0x8] sm:$0xff]  ;;  %vm801_vm0 = vcmask 719872   ;;  %v766_v29 = vld [vmem:[%s2484_s4] sm:$0xff] }
  0x4a   : > { %v769_v30 = vld [vmem:[%s2484_s4 + $0x18] sm:$0xff]  ;;  %v768_v31 = vld [vmem:[%s2484_s4 + $0x10] sm:$0xff]  ;;  %v771_v32 = vld [vmem:[%s2484_s4 + $0x28] sm:$0xff]  ;;  %vm874_vm1 = vcmask 261120   ;;  %s3132_s1 = sld [smem:[#allocation20_spill]]  ;;  %vm952_vm2 = vcmask 1041408  }
  0x4b   : > { %v770_v33 = vld [vmem:[%s2484_s4 + $0x20] sm:$0xff]  ;;  %v773_v34 = vld [vmem:[%s2484_s4 + $0x38] sm:$0xff]  ;;  %v772_v35 = vld [vmem:[%s2484_s4 + $0x30] sm:$0xff]  ;;  %s3133_s27 = sld [smem:[#allocation21_spill]]  ;;  %vm993_vm6 = vcmask 64512   ;;  %vm1040_vm7 = vcmask 15360  }
  0x4c   : > { %v2607_v51 = vld [vmem:[%s3078_s11] sm:$0x3]  ;;  %v2612_v52 = vld [vmem:[%s3076_s9 + $0x78] sm:$0xff]  ;;  %v2622_v54 = vld [vmem:[%s3076_s9 + $0x70] sm:$0xff]  ;;  %s3134_s7 = sld [smem:[#allocation25_spill]]  ;;  %vm1131_vm8 = vcmask 1040384  }
  0x4d   : > { %v2630_v55 = vld [vmem:[%s3076_s9 + $0x68] sm:$0xff]  ;;  %v2636_v56 = vld [vmem:[%s3076_s9 + $0x60] sm:$0xff]  ;;  %v2642_v57 = vld [vmem:[%s3076_s9 + $0x58] sm:$0xff]  ;;  %s3135_s8 = sld [smem:[#allocation26_spill]]  ;;  %vm1144_vm9 = vcmask 1046528   ;;  %vm1557_vm13 = vcmask 7168  }
  0x4e   : > { %v2648_v58 = vld [vmem:[%s3076_s9 + $0x50] sm:$0xff]  ;;  %v2654_v59 = vld [vmem:[%s3076_s9 + $0x48] sm:$0xff]  ;;  %v2660_v60 = vld [vmem:[%s3076_s9 + $0x40] sm:$0xff]  ;;  %s3136_s19 = sld [smem:[#allocation23_spill]]  ;;  %s1964_s26 = sshll.u32 %s2405_s16, 5 }
  0x4f   : > { %v789_v1 = vld [vmem:[%s3131_s2 + $0x78] sm:$0xff]  ;;  %v788_v2 = vld [vmem:[%s3131_s2 + $0x70] sm:$0xff]  ;;  %v787_v3 = vld [vmem:[%s3131_s2 + $0x68] sm:$0xff]  ;;  %s3137_s3 = sld [smem:[#allocation24_spill]]  ;;  %s1797_s16 = scalar_lea.sflag [#allocation5], %s2480_s5 }
  0x50   : > { %814 = vmatpush.msra.mxu0 %v789_v1  ;;  %v800_v4 = vld [vmem:[%s3131_s2 + $0xd0] sm:$0xff]  ;;  %v799_v5 = vld [vmem:[%s3131_s2 + $0xc8] sm:$0xff]  ;;  %v786_v6 = vld [vmem:[%s3131_s2 + $0x60] sm:$0xff]  ;;  %s3138_s24 = sld [smem:[#allocation28_spill]] }
  0x51   : > { %848 = vmatpush.msra.mxu1 %v800_v4  ;;  %v798_v7 = vld [vmem:[%s3131_s2 + $0xc0] sm:$0xff]  ;;  %v785_v8 = vld [vmem:[%s3131_s2 + $0x58] sm:$0xff]  ;;  %v784_v10 = vld [vmem:[%s3131_s2 + $0x50] sm:$0xff]  ;;  %s3140_s21 = sld [smem:[#allocation30_spill]] }
  0x52   : > { %815 = vmatpush.msra.mxu0 %v788_v2  ;;  %v797_v9 = vld [vmem:[%s3131_s2 + $0xb8] sm:$0xff]  ;;  %v796_v11 = vld [vmem:[%s3131_s2 + $0xb0] sm:$0xff]  ;;  %v783_v12 = vld [vmem:[%s3131_s2 + $0x48] sm:$0xff] }
  0x53   : > { %849 = vmatpush.msra.mxu1 %v799_v5  ;;  %v782_v13 = vld [vmem:[%s3131_s2 + $0x40] sm:$0xff]  ;;  %v795_v14 = vld [vmem:[%s3131_s2 + $0xa8] sm:$0xff]  ;;  %v781_v16 = vld [vmem:[%s3131_s2 + $0x38] sm:$0xff] }
  0x54   : > { %816 = vmatpush.msra.mxu0 %v787_v3  ;;  %v794_v15 = vld [vmem:[%s3131_s2 + $0xa0] sm:$0xff]  ;;  %v793_v17 = vld [vmem:[%s3131_s2 + $0x98] sm:$0xff]  ;;  %v780_v18 = vld [vmem:[%s3131_s2 + $0x30] sm:$0xff] }
  0x55   : > { %850 = vmatpush.msra.mxu1 %v798_v7  ;;  %v792_v19 = vld [vmem:[%s3131_s2 + $0x90] sm:$0xff]  ;;  %v779_v20 = vld [vmem:[%s3131_s2 + $0x28] sm:$0xff]  ;;  %v778_v22 = vld [vmem:[%s3131_s2 + $0x20] sm:$0xff] }
  0x56   : > { %817 = vmatpush.msra.mxu0 %v786_v6  ;;  %v791_v21 = vld [vmem:[%s3131_s2 + $0x88] sm:$0xff]  ;;  %v790_v23 = vld [vmem:[%s3131_s2 + $0x80] sm:$0xff]  ;;  %v777_v25 = vld [vmem:[%s3131_s2 + $0x18] sm:$0xff] }
  0x57   : > { %851 = vmatpush.msra.mxu1 %v797_v9  ;;  %v776_v26 = vld [vmem:[%s3131_s2 + $0x10] sm:$0xff]  ;;  %v775_v27 = vld [vmem:[%s3131_s2 + $0x8] sm:$0xff]  ;;  %v774_v28 = vld [vmem:[%s3131_s2] sm:$0xff]  ;;  %s1808_s22 = scalar_lea.hbm %s3140_s21, %s1964_s26  ;;  %s2205_s20 = scalar_lea.hbm %s3140_s21, 64 }
  0x58   : > { %818 = vmatpush.msra.mxu0 %v785_v8  ;;  %v2666_v61 = vld [vmem:[%s3076_s9 + $0x38] sm:$0xff]  ;;  %v2672_v62 = vld [vmem:[%s3076_s9 + $0x30] sm:$0xff]  ;;  %v2678_v63 = vld [vmem:[%s3076_s9 + $0x28] sm:$0xff]  ;;  %s1811_s6 = sshll.u32 %s1808_s22, 4  ;;  %s1812_s6 = int_to_ptr.hbm [resolvable:$true] %s1811_s6 }
  0x59   : > { %852 = vmatpush.msra.mxu1 %v796_v11  ;;  %v2685_v0 = vld [vmem:[%s3076_s9 + $0x20] sm:$0xff]  ;;  %v2691_v1 = vld [vmem:[%s3076_s9 + $0x18] sm:$0xff]  ;;  %v2697_v2 = vld [vmem:[%s3076_s9 + $0x10] sm:$0xff]  ;;  %s2199_s2 = sshra.s32 %s1812_s6, 4  ;;  %s2200_s2 = int_to_ptr.hbm [resolvable:$true] %s2199_s2 }
  0x5a   : > { %819 = vmatpush.msra.mxu0 %v784_v10  ;;  %v2703_v3 = vld [vmem:[%s3076_s9 + $0x8] sm:$0xff]  ;;  %v2709_v4 = vld [vmem:[%s3076_s9] sm:$0xff]  ;;  %p2206_p11 = scmp.lt.s32.totalorder %s2200_s2, %s3140_s21 }
  0x5b   : > { %853 = vmatpush.msra.mxu1 %v795_v14  ;;  %v872_v5 = vld [vmem:[%s3132_s1] sm:$0x1] }
  0x5c   : > { %820 = vmatpush.msra.mxu0 %v783_v12  ;;  %v936_v6 = vmul.f32 2.0, %v872_v5  ;;  %v873_v7 = vld [vmem:[%s3133_s27] sm:$0x1]  ;;  %v931_v9 = vmul.f32 %v872_v5, %v872_v5 }
  0x5d   : > { %854 = vmatpush.msra.mxu1 %v794_v15  ;;  %v943_v10 = vmul.f32 %v873_v7, %v873_v7  ;;  %v2069_v15 = vld [vmem:[%s3132_s1] ss:$0 sm:$0xff]  ;;  %s3139_s1 = sld [smem:[#allocation29_spill]] }
  0x5e   : > { %821 = vmatpush.msra.mxu0 %v782_v13  ;;  %v937_v8 = vmul.f32 %v936_v6, %v873_v7  ;;  %v933_v12 = vperm.slane %v931_v9, 0  ;;  %v2742_v5 = vld [vmem:[%s3134_s7] ss:$0 sm:$0xff] }
  0x5f   : > { %855 = vmatpush.msra.mxu1 %v793_v17  ;;  %v944_v13 = vmul.f32 16.0, %v943_v10 }
  0x60   : > { %822 = vmatpush.msra.mxu0 %v781_v16  ;;  %v939_v11 = vperm.slane %v937_v8, 0  ;;  %v926_v16 = vmul.f32 16.0, %v873_v7  ;;  %v1160_v7 = vld [vmem:[%s3080_s13 + $0x18] sm:$0xff]  ;;  %v1159_v8 = vld [vmem:[%s3080_s13 + $0x10] sm:$0xff] }
  0x61   : > { %856 = vmatpush.msra.mxu1 %v792_v19 }
  0x62   : > { %823 = vmatpush.msra.mxu0 %v780_v18 }
  0x63   : > { %857 = vmatpush.msra.mxu1 %v791_v21 }
  0x64   : > { %824 = vmatpush.msra.mxu0 %v779_v20  ;;  %v946_v20 = vperm.slane %v944_v13, 0 }
  0x65   : > { %858 = vmatpush.msra.mxu1 %v790_v23 }
  0x66   : > { %825 = vmatpush.msra.mxu0 %v778_v22  ;;  %1918 = vmatmul.msk.f32.vlgmr.msra.gmra.mxu1 %vm801_vm0, %v767_v24  ;;  %v928_v22 = vperm.slane %v926_v16, 0  ;;  %v2757_v16 = vld [vmem:[%s3135_s8] ss:$0 sm:$0xff] }
  0x68   : > { %826 = vmatpush.msra.mxu0 %v777_v25 }
  0x6a   : > { %827 = vmatpush.msra.mxu0 %v776_v26 }
  0x6c   : > { %828 = vmatpush.msra.mxu0 %v775_v27 }
  0x6e   : > { %829 = vmatpush.msra.mxu0 %v774_v28  ;;  %1919 = vmatmul.msk.f32.gmra.mxu1 %vm801_vm0, %v769_v30  ;;  %v2725_v28 = vld [vmem:[%s3077_s10] sm:$0xff] }
  0x6f   : > { %830 = vmatmul.f32.vlgmr.msra.gmra.mxu0 %v766_v29 }
  0x76   : > { %1920 = vmatmul.msk.f32.gmra.mxu1 %vm801_vm0, %v771_v32 }
  0x77   : > { %833 = vmatmul.f32.gmra.mxu0 %v768_v31 }
  0x7e   : > { %1921 = vmatmul.msk.f32.gmra.mxu1 %vm801_vm0, %v773_v34 }
  0x7f   : > { %836 = vmatmul.f32.gmra.mxu0 %v770_v33 }
  0x87   : > { %839 = vmatmul.f32.gmra.mxu0 %v772_v35 }
  0xe3   : > { %v860_v36 = vpop.f32.mrf.mxu1 }
  0xeb   : > { %v863_v38 = vpop.f32.mrf.mxu1 }
  0xec   : > { %v831_v37 = vpop.f32.mrf.mxu0 }
  0xed   : > { %v2596_v48 = vadd.f32 %v860_v36, %v831_v37 }
  0xef   : > { %v898_v53 = vmul.f32 %v2596_v48, %v2596_v48 }
  0xf3   : > { %v866_v40 = vpop.f32.mrf.mxu1 }
  0xf4   : > { %v834_v39 = vpop.f32.mrf.mxu0 }
  0xf5   : > { %v2591_v46 = vadd.f32 %v863_v38, %v834_v39 }
  0xf7   : > { %v899_v50 = vmul.f32 %v2591_v46, %v2591_v46 }
  0xfb   : > { %v869_v42 = vpop.f32.mrf.mxu1 }
  0xfc   : > { %v837_v41 = vpop.f32.mrf.mxu0 }
  0xfd   : > { %v2587_v44 = vadd.f32 %v866_v40, %v837_v41 }
  0xff   : > { %v900_v49 = vmul.f32 %v2587_v44, %v2587_v44 }
 0x104   : > { %v840_v43 = vpop.f32.mrf.mxu0 }
 0x105   : > { %v2589_v45 = vadd.f32 %v869_v42, %v840_v43 }
 0x107   : > { %890 = vmatpush.msra.mxu2 %v2589_v45  ;;  %v901_v47 = vmul.f32 %v2589_v45, %v2589_v45 }
 0x109   : > { %891 = vmatpush.msra.mxu2 %v2587_v44  ;;  %914 = vmatpush.msra.mxu3 %v901_v47  ;;  %v1186_v47 = vld [vmem:[%s3081_s14 + $0x8] sm:$0xff] }
 0x10b   : > { %892 = vmatpush.msra.mxu2 %v2591_v46  ;;  %915 = vmatpush.msra.mxu3 %v900_v49  ;;  %v1185_v49 = vld [vmem:[%s3081_s14] sm:$0xff] }
 0x10d   : > { %893 = vmatpush.msra.mxu2 %v2596_v48  ;;  %916 = vmatpush.msra.mxu3 %v899_v50  ;;  %v2263_v50 = vmov 0  }
 0x10e   : > { %1922 = vmatmul.msk.f32.vlgmr.msra.gmra.mxu2 %vm874_vm1, %v2607_v51  ;;  %2067 = vset.pattern.permute.xlu1 %v2263_v50 }
 0x10f   : > { %917 = vmatpush.msra.mxu3 %v898_v53  ;;  %954 = vmatpush.msrb.mxu2 %v2612_v52  ;;  %v2071_v53 = vld [vmem:[%s3133_s27] ss:$0 sm:$0xff] }
 0x110   : > { %1923 = vmatmul.msk.f32.vlgmr.msra.gmra.mxu3 %vm874_vm1, %v2607_v51  ;;  %2066 = vset.pattern.permute.xlu0 %v2263_v50 }
 0x111   : > { %955 = vmatpush.msrb.mxu2 %v2622_v54  ;;  %1012 = vmatpush.msrb.mxu3 %v2725_v28 }
 0x112   : > { %1196 = vperm.xlu1 %2067, %v1186_v47   ;;  %1191 = vperm.xlu0 %2066, %v1185_v49   ;;  %v1221_v47 = vld [vmem:[#allocation6 + $0x40] sm:$0xff]  ;;  %v1238_v49 = vld [vmem:[#allocation6 + $0xc8] sm:$0xff] }
 0x113   : > { %956 = vmatpush.msrb.mxu2 %v2630_v55  ;;  %2068 = vset.pattern.permute.xlu2 %v2263_v50  ;;  %v2793_v50 = vld [vmem:[%s3079_s12 + $0x10] sm:$0xff] }
 0x115   : > { %957 = vmatpush.msrb.mxu2 %v2636_v56 }
 0x117   : > { %958 = vmatpush.msrb.mxu2 %v2642_v57 }
 0x119   : > { %959 = vmatpush.msrb.mxu2 %v2648_v58 }
 0x11a   : > { %1178 = vperm.xlu1 %2067, %v1160_v7   ;;  %1173 = vperm.xlu0 %2066, %v1159_v8   ;;  %v1219_v7 = vld [vmem:[#allocation6 + $0x30] sm:$0xff]  ;;  %v1236_v8 = vld [vmem:[#allocation6 + $0xb8] sm:$0xff] }
 0x11b   : > { %960 = vmatpush.msrb.mxu2 %v2654_v59 }
 0x11d   : > { %961 = vmatpush.msrb.mxu2 %v2660_v60 }
 0x11f   : > { %962 = vmatpush.msrb.mxu2 %v2666_v61 }
 0x121   : > { %963 = vmatpush.msrb.mxu2 %v2672_v62 }
 0x123   : > { %964 = vmatpush.msrb.mxu2 %v2678_v63 }
 0x125   : > { %965 = vmatpush.msrb.mxu2 %v2685_v0 }
 0x127   : > { %966 = vmatpush.msrb.mxu2 %v2691_v1 }
 0x129   : > { %967 = vmatpush.msrb.mxu2 %v2697_v2 }
 0x12b   : > { %968 = vmatpush.msrb.mxu2 %v2703_v3 }
 0x12d   : > { %969 = vmatpush.msrb.mxu2 %v2709_v4 }
 0x191   : > { %v895_v14 = vpop.f32.mrf.mxu2 }
 0x192   : > { %v941_v17 = vmul.f32 %v939_v11, %v895_v14  ;;  %v925_v21 = vmul.f32 %v2069_v15, %v895_v14 }
 0x193   : > { %v919_v18 = vpop.f32.mrf.mxu3 }
 0x194   : > { %v935_v19 = vmul.f32 %v933_v12, %v919_v18  ;;  %v930_v25 = vadd.f32 %v928_v22, %v925_v21  ;;  %v1187_v12 = vld [vmem:[%s3081_s14 + $0x10] sm:$0xff]  ;;  %v1244_v21 = vld [vmem:[#allocation6 + $0xf8] sm:$0xff] }
 0x195   : > { %1201 = vperm.xlu2 %2068, %v1187_v12   ;;  %v1233_v12 = vld [vmem:[#allocation6 + $0xa0] sm:$0xff] }
 0x196   : > { %v942_v23 = vadd.f32 %v941_v17, %v935_v19  ;;  %v1228_v17 = vld [vmem:[#allocation6 + $0x78] sm:$0xff] }
 0x197   : > { %v2763_v19 = vld [vmem:[%s3079_s12] sm:$0xff]  ;;  %1261 = vmatpush.msrb.mxu1 %v1228_v17 }
 0x198   : > { %v948_v24 = vadd.f32 %v946_v20, %v942_v23  ;;  %v1227_v20 = vld [vmem:[#allocation6 + $0x70] sm:$0xff] }
 0x199   : > { %v1188_v23 = vld [vmem:[%s3081_s14 + $0x18] sm:$0xff]  ;;  %1262 = vmatpush.msrb.mxu1 %v1227_v20 }
 0x19a   : > { %v950_v26 = vrot.slane %v948_v24, 6  ;;  %v1260_v24 = vld [vmem:[#allocation6 + $0x178] sm:$0xff]  ;;  %1206 = vperm.xlu0 %2066, %v1188_v23  }
 0x19b   : > { %1319 = vmatpush.msrb.mxu0 %v1260_v24  ;;  %v1252_v23 = vld [vmem:[#allocation6 + $0x138] sm:$0xff]  ;;  %v1229_v24 = vld [vmem:[#allocation6 + $0x80] sm:$0xff] }
 0x19c   : > { %v953_v27 = vsel %vm952_vm2, %v930_v25, %v950_v26  ;;  %v1158_v25 = vld [vmem:[%s3080_s13 + $0x8] sm:$0xff]  ;;  %v1157_v26 = vld [vmem:[%s3080_s13] sm:$0xff] }
 0x19d   : > { %970 = vmatmul.f32.vlgmr.msrb.gmra.mxu2 %v953_v27  ;;  %v1243_v27 = vld [vmem:[#allocation6 + $0xf0] sm:$0xff]  ;;  %1168 = vperm.xlu1 %2067, %v1158_v25  }
 0x19e   : > { %1163 = vperm.xlu2 %2068, %v1157_v26   ;;  %v1215_v25 = vld [vmem:[#allocation6 + $0x10] sm:$0xff] }
 0x19f   : > { %v1251_v26 = vld [vmem:[#allocation6 + $0x130] sm:$0xff] }
 0x220   : > { %v971_v29 = vpop.f32.mrf.mxu2 }
 0x221   : > { %v974_v30 = vmul.f32 0.00390625, %v971_v29  ;;  %v1226_v29 = vld [vmem:[#allocation6 + $0x68] sm:$0xff] }
 0x222   : > { %1263 = vmatpush.msrb.mxu1 %v1226_v29 }
 0x223   : > { %v975_v31 = vmul.f32 %v974_v30, %v974_v30 }
 0x225   : > { %v977_v32 = vrot.slane %v975_v31, 6  ;;  %v1242_v31 = vld [vmem:[#allocation6 + $0xe8] sm:$0xff] }
 0x227   : > { %v979_v33 = vsub.f32 %v974_v30, %v977_v32  ;;  %v1225_v32 = vld [vmem:[#allocation6 + $0x60] sm:$0xff] }
 0x228   : > { %1264 = vmatpush.msrb.mxu1 %v1225_v32 }
 0x229   : > { %v980_v34 = vmax.f32 %v979_v33, 0.0  ;;  %v1258_v33 = vld [vmem:[#allocation6 + $0x168] sm:$0xff] }
 0x22b   : > { %v981_v35 = vadd.f32 1e-05, %v980_v34  ;;  %v2784_v34 = vld [vmem:[%s3079_s12 + $0x8] sm:$0xff] }
 0x22d   : > { %2079 = vrsqrt.f32 %v981_v35  ;;  %vm988_vm4 = vweird.f32 %v981_v35 }
 0x233   : > { %v2080_v36 = vpop.eup %2079 }
 0x234   : > { %v983_v37 = vmul.f32 %v2080_v36, %v981_v35  ;;  %vm989_vm3 = vweird.f32 %v2080_v36  ;;  %v1224_v35 = vld [vmem:[#allocation6 + $0x58] sm:$0xff] }
 0x235   : > { %vm990_vm5 = vmor %vm988_vm4, %vm989_vm3  ;;  %1265 = vmatpush.msrb.mxu1 %v1224_v35 }
 0x236   : > { %v984_v38 = vmul.f32 %v2080_v36, %v983_v37  ;;  %v1257_v37 = vld [vmem:[#allocation6 + $0x160] sm:$0xff] }
 0x238   : > { %v985_v39 = vmul.f32 0.5, %v984_v38  ;;  %v1223_v38 = vld [vmem:[#allocation6 + $0x50] sm:$0xff] }
 0x239   : > { %1266 = vmatpush.msrb.mxu1 %v1223_v38 }
 0x23a   : > { %v986_v40 = vsub.f32 1.5, %v985_v39  ;;  %v1240_v39 = vld [vmem:[#allocation6 + $0xd8] sm:$0xff] }
 0x23c   : > { %v987_v41 = vmul.f32 %v2080_v36, %v986_v40  ;;  %v1256_v40 = vld [vmem:[#allocation6 + $0x158] sm:$0xff] }
 0x23e   : > { %v991_v42 = vsel %vm990_vm5, %v2080_v36, %v987_v41  ;;  %v1241_v36 = vld [vmem:[#allocation6 + $0xe0] sm:$0xff]  ;;  %v1222_v41 = vld [vmem:[#allocation6 + $0x48] sm:$0xff] }
 0x23f   : > { %v992_v43 = vsel %vm952_vm2, %v974_v30, %v991_v42  ;;  %v1259_v30 = vld [vmem:[#allocation6 + $0x170] sm:$0xff]  ;;  %1267 = vmatpush.msrb.mxu1 %v1222_v41 }
 0x240   : > { %1924 = vmatmul.msk.f32.vlgmr.msrb.gmra.mxu3 %vm993_vm6, %v992_v43  ;;  %1320 = vmatpush.msrb.mxu0 %v1259_v30  ;;  %v1239_v42 = vld [vmem:[#allocation6 + $0xd0] sm:$0xff]  ;;  %v1213_v30 = vld [vmem:[#allocation6] sm:$0xff] }
 0x241   : > { %v1255_v43 = vld [vmem:[#allocation6 + $0x150] sm:$0xff]  ;;  %1268 = vmatpush.msrb.mxu1 %v1221_v47 }
 0x242   : > { %1321 = vmatpush.msrb.mxu0 %v1258_v33  ;;  %v1247_v33 = vld [vmem:[#allocation6 + $0x110] sm:$0xff] }
 0x244   : > { %1322 = vmatpush.msrb.mxu0 %v1257_v37 }
 0x246   : > { %1323 = vmatpush.msrb.mxu0 %v1256_v40 }
 0x248   : > { %1324 = vmatpush.msrb.mxu0 %v1255_v43 }
 0x2c3   : > { %v1014_v6 = vpop.f32.mrf.mxu3 }
 0x2c4   : > { %v1017_v9 = vmul.f32 %v2069_v15, %v1014_v6  ;;  %v1025_v10 = vsub.f32 %v2071_v53, %v1014_v6  ;;  %v1027_v11 = vrot.slane %v1014_v6, 2  ;;  %v1220_v53 = vld [vmem:[#allocation6 + $0x38] sm:$0xff]  ;;  %v1237_v6 = vld [vmem:[#allocation6 + $0xc0] sm:$0xff] }
 0x2c5   : > { %1269 = vmatpush.msrb.mxu1 %v1220_v53 }
 0x2c6   : > { %v1021_v13 = vmul.f32 %v2742_v5, %v1017_v9  ;;  %v1029_v14 = vmul.f32 %v1027_v11, %v1025_v10  ;;  %v1235_v9 = vld [vmem:[#allocation6 + $0xb0] sm:$0xff]  ;;  %v1234_v10 = vld [vmem:[#allocation6 + $0xa8] sm:$0xff] }
 0x2c7   : > { %1270 = vmatpush.msrb.mxu1 %v1219_v7  ;;  %v2802_v11 = vld [vmem:[%s3079_s12 + $0x18] sm:$0xff] }
 0x2c8   : > { %v1030_v15 = vmul.f32 %v2742_v5, %v1029_v14  ;;  %v1038_v18 = vrot.slane %v1021_v13, 2  ;;  %v1232_v13 = vld [vmem:[#allocation6 + $0x98] sm:$0xff]  ;;  %v1218_v14 = vld [vmem:[#allocation6 + $0x28] sm:$0xff] }
 0x2c9   : > { %1271 = vmatpush.msrb.mxu1 %v1218_v14 }
 0x2ca   : > { %v1034_v22 = vadd.f32 %v2757_v16, %v1030_v15  ;;  %1926 = vmatpush.msk.msra.mxu3 %vm952_vm2, %v1038_v18  ;;  %v1231_v15 = vld [vmem:[#allocation6 + $0x90] sm:$0xff]  ;;  %v1217_v18 = vld [vmem:[#allocation6 + $0x20] sm:$0xff] }
 0x2cb   : > { %1927 = vmatmul.msk.f32.vlgmr.msra.gmra.mxu3 %vm1040_vm7, %v2763_v19  ;;  %1272 = vmatpush.msrb.mxu1 %v1217_v18 }
 0x2cc   : > { %1931 = vmatpush.msk.msra.mxu2 %vm952_vm2, %v1034_v22  ;;  %1290 = vmatpush.msrb.mxu3 %v1244_v21  ;;  %v1230_v21 = vld [vmem:[#allocation6 + $0x88] sm:$0xff]  ;;  %v1216_v22 = vld [vmem:[#allocation6 + $0x18] sm:$0xff] }
 0x2cd   : > { %1932 = vmatmul.msk.f32.vlgmr.msra.gmra.mxu2 %vm1040_vm7, %v2763_v19  ;;  %1273 = vmatpush.msrb.mxu1 %v1216_v22 }
 0x2ce   : > { %1291 = vmatpush.msrb.mxu3 %v1243_v27  ;;  %1965 = vmatpush.msrb.mxu2 %v1228_v17  ;;  %v1254_v17 = vld [vmem:[#allocation6 + $0x148] sm:$0xff] }
 0x2cf   : > { %1325 = vmatpush.msrb.mxu0 %v1254_v17  ;;  %1274 = vmatpush.msrb.mxu1 %v1215_v25  ;;  %v1214_v27 = vld [vmem:[#allocation6 + $0x8] sm:$0xff] }
 0x2d0   : > { %1292 = vmatpush.msrb.mxu3 %v1242_v31  ;;  %1966 = vmatpush.msrb.mxu2 %v1227_v20  ;;  %v1253_v20 = vld [vmem:[#allocation6 + $0x140] sm:$0xff] }
 0x2d1   : > { %1326 = vmatpush.msrb.mxu0 %v1253_v20  ;;  %1275 = vmatpush.msrb.mxu1 %v1214_v27  ;;  %v1249_v31 = vld [vmem:[#allocation6 + $0x120] sm:$0xff] }
 0x2d2   : > { %1293 = vmatpush.msrb.mxu3 %v1241_v36  ;;  %1967 = vmatpush.msrb.mxu2 %v1226_v29  ;;  %v1250_v29 = vld [vmem:[#allocation6 + $0x128] sm:$0xff] }
 0x2d3   : > { %1928 = vmatmul.msk.f32.gmra.mxu3 %vm1040_vm7, %v2784_v34  ;;  %1327 = vmatpush.msrb.mxu0 %v1252_v23 }
 0x2d4   : > { %1294 = vmatpush.msrb.mxu3 %v1240_v39  ;;  %1968 = vmatpush.msrb.mxu2 %v1225_v32  ;;  %v1248_v32 = vld [vmem:[#allocation6 + $0x118] sm:$0xff] }
 0x2d5   : > { %1933 = vmatmul.msk.f32.gmra.mxu2 %vm1040_vm7, %v2784_v34  ;;  %1328 = vmatpush.msrb.mxu0 %v1251_v26 }
 0x2d6   : > { %1295 = vmatpush.msrb.mxu3 %v1239_v42  ;;  %1969 = vmatpush.msrb.mxu2 %v1224_v35  ;;  %v1246_v35 = vld [vmem:[#allocation6 + $0x108] sm:$0xff] }
 0x2d7   : > { %1329 = vmatpush.msrb.mxu0 %v1250_v29  ;;  %1276 = vmatpush.msrb.mxu1 %v1213_v30 }
 0x2d8   : > { %1296 = vmatpush.msrb.mxu3 %v1238_v49  ;;  %1970 = vmatpush.msrb.mxu2 %v1223_v38 }
 0x2d9   : > { %1330 = vmatpush.msrb.mxu0 %v1249_v31 }
 0x2da   : > { %1297 = vmatpush.msrb.mxu3 %v1237_v6  ;;  %1971 = vmatpush.msrb.mxu2 %v1222_v41 }
 0x2db   : > { %1929 = vmatmul.msk.f32.gmra.mxu3 %vm1040_vm7, %v2793_v50  ;;  %1331 = vmatpush.msrb.mxu0 %v1248_v32 }
 0x2dc   : > { %1298 = vmatpush.msrb.mxu3 %v1236_v8  ;;  %1972 = vmatpush.msrb.mxu2 %v1221_v47 }
 0x2dd   : > { %1934 = vmatmul.msk.f32.gmra.mxu2 %vm1040_vm7, %v2793_v50  ;;  %1332 = vmatpush.msrb.mxu0 %v1247_v33 }
 0x2de   : > { %1299 = vmatpush.msrb.mxu3 %v1235_v9  ;;  %1973 = vmatpush.msrb.mxu2 %v1220_v53 }
 0x2df   : > { %1333 = vmatpush.msrb.mxu0 %v1246_v35 }
 0x2e0   : > { %1300 = vmatpush.msrb.mxu3 %v1234_v10  ;;  %1974 = vmatpush.msrb.mxu2 %v1219_v7 }
 0x2e2   : > { %1301 = vmatpush.msrb.mxu3 %v1233_v12  ;;  %1975 = vmatpush.msrb.mxu2 %v1218_v14 }
 0x2e3   : > { %1930 = vmatmul.msk.f32.gmra.mxu3 %vm1040_vm7, %v2802_v11 }
 0x2e4   : > { %1302 = vmatpush.msrb.mxu3 %v1232_v13  ;;  %1976 = vmatpush.msrb.mxu2 %v1217_v18 }
 0x2e5   : > { %1935 = vmatmul.msk.f32.gmra.mxu2 %vm1040_vm7, %v2802_v11 }
 0x2e6   : > { %1303 = vmatpush.msrb.mxu3 %v1231_v15  ;;  %1977 = vmatpush.msrb.mxu2 %v1216_v22 }
 0x2e8   : > { %1304 = vmatpush.msrb.mxu3 %v1230_v21  ;;  %1978 = vmatpush.msrb.mxu2 %v1215_v25 }
 0x2ea   : > { %1305 = vmatpush.msrb.mxu3 %v1229_v24  ;;  %1979 = vmatpush.msrb.mxu2 %v1214_v27 }
 0x2ec   : > { %1425 = vmatpush.msra.mxu3 %v2612_v52  ;;  %1980 = vmatpush.msrb.mxu2 %v1213_v30  ;;  %v1245_v52 = vld [vmem:[#allocation6 + $0x100] sm:$0xff] }
 0x2ed   : > { %1334 = vmatpush.msrb.mxu0 %v1245_v52 }
 0x2ee   : > { %1426 = vmatpush.msra.mxu3 %v2622_v54  ;;  %v1197_v54 = vpop.permute.xlu1 %1196 }
 0x2f0   : > { %1427 = vmatpush.msra.mxu3 %v2630_v55  ;;  %v2819_v55 = vpop.permute.xlu2 %1201 }
 0x2f2   : > { %1428 = vmatpush.msra.mxu3 %v2636_v56 }
 0x2f4   : > { %1429 = vmatpush.msra.mxu3 %v2642_v57 }
 0x2f6   : > { %1430 = vmatpush.msra.mxu3 %v2648_v58 }
 0x2f8   : > { %1431 = vmatpush.msra.mxu3 %v2654_v59 }
 0x2fa   : > { %1432 = vmatpush.msra.mxu3 %v2660_v60 }
 0x2fc   : > { %1433 = vmatpush.msra.mxu3 %v2666_v61  ;;  %v1179_v61 = vpop.permute.xlu1 %1178 }
 0x2fe   : > { %1434 = vmatpush.msra.mxu3 %v2672_v62  ;;  %v1164_v62 = vpop.permute.xlu2 %1163 }
 0x300   : > { %1435 = vmatpush.msra.mxu3 %v2678_v63 }
 0x302   : > { %1436 = vmatpush.msra.mxu3 %v2685_v0 }
 0x304   : > { %1437 = vmatpush.msra.mxu3 %v2691_v1 }
 0x306   : > { %1438 = vmatpush.msra.mxu3 %v2697_v2 }
 0x308   : > { %1439 = vmatpush.msra.mxu3 %v2703_v3  ;;  %v1192_v3 = vpop.permute.xlu0 %1191 }
 0x30a   : > { %1440 = vmatpush.msra.mxu3 %v2709_v4  ;;  %v1169_v4 = vpop.permute.xlu1 %1168 }
 0x310   : > { %v1174_v13 = vpop.permute.xlu0 %1173 }
 0x318   : > { %v1207_v30 = vpop.permute.xlu0 %1206 }
 0x34e   : > { %v1074_v56 = vpop.f32.mrf.mxu3 }
 0x34f   : > { %v1115_v57 = vmul.f32 %v1074_v56, %v2596_v48 }
 0x350   : > { %v1103_v58 = vpop.f32.mrf.mxu2 }
 0x351   : > { %v1119_v59 = vadd.f32 %v1115_v57, %v1103_v58 }
 0x353   : > { %v1123_v60 = vmax.f32 %v1119_v59, 0.0 }
 0x355   : > { %1306 = vmatmul.f32.vlgmr.msrb.gmra.mxu3 %v1123_v60  ;;  %v1132_v63 = vrot.slane %v1123_v60, 7  ;;  %v1145_v39 = vrot.slane %v1123_v60, 1 }
 0x356   : > { %v1077_v0 = vpop.f32.mrf.mxu3 }
 0x357   : > { %v1116_v36 = vmul.f32 %v1077_v0, %v2591_v46  ;;  %v1143_v1 = vsel %vm1131_vm8, 0.0, %v1132_v63 }
 0x358   : > { %v1181_v48 = vmul.f32 %v1164_v62, %v1143_v1  ;;  %v1106_v37 = vpop.f32.mrf.mxu2 }
 0x359   : > { %v1120_v38 = vadd.f32 %v1116_v36, %v1106_v37 }
 0x35a   : > { %1277 = vmatmul.f32.vlgmr.msrb.gmra.mxu1 %v1181_v48 }
 0x35b   : > { %v1124_v2 = vmax.f32 %v1120_v38, 0.0 }
 0x35d   : > { %v1133_v40 = vrot.slane %v1124_v2, 7  ;;  %v1146_v41 = vrot.slane %v1124_v2, 1  ;;  %1309 = vmatmul.f32.gmra.mxu3 %v1124_v2 }
 0x35e   : > { %v1080_v42 = vpop.f32.mrf.mxu3 }
 0x35f   : > { %v1117_v43 = vmul.f32 %v1080_v42, %v2587_v44  ;;  %v1134_v47 = vsel %vm1131_vm8, %v1132_v63, %v1133_v40  ;;  %v1147_v46 = vsel %vm1144_vm9, %v1145_v39, %v1146_v41  ;;  %v1349_v42 = vld [vmem:[%s3137_s3] sm:$0x1] }
 0x360   : > { %v1182_v49 = vmul.f32 %v1169_v4, %v1134_v47  ;;  %v1109_v53 = vpop.f32.mrf.mxu2  ;;  %v1209_v6 = vmul.f32 %v1192_v3, %v1147_v46  ;;  %v1415_v46 = vmul.f32 %v1349_v42, %v1349_v42 }
 0x361   : > { %v1121_v7 = vadd.f32 %v1117_v43, %v1109_v53 }
 0x362   : > { %1280 = vmatmul.f32.gmra.mxu1 %v1182_v49  ;;  %1335 = vmatmul.f32.vlgmr.msrb.gmra.mxu0 %v1209_v6 }
 0x363   : > { %v1125_v8 = vmax.f32 %v1121_v7, 0.0  ;;  %v1416_v7 = vmul.f32 16.0, %v1415_v46 }
 0x365   : > { %v1135_v9 = vrot.slane %v1125_v8, 7  ;;  %v1148_v10 = vrot.slane %v1125_v8, 1  ;;  %1312 = vmatmul.f32.gmra.mxu3 %v1125_v8 }
 0x366   : > { %v1083_v12 = vpop.f32.mrf.mxu3 }
 0x367   : > { %v1118_v14 = vmul.f32 %v1083_v12, %v2589_v45  ;;  %v1136_v44 = vsel %vm1131_vm8, %v1133_v40, %v1135_v9  ;;  %v1149_v17 = vsel %vm1144_vm9, %v1146_v41, %v1148_v10  ;;  %v1348_v41 = vld [vmem:[%s3136_s19] sm:$0x1]  ;;  %v1418_v12 = vperm.slane %v1416_v7, 0 }
 0x368   : > { %v1112_v15 = vpop.f32.mrf.mxu2  ;;  %v1183_v18 = vmul.f32 %v1174_v13, %v1136_v44  ;;  %v1210_v20 = vmul.f32 %v1197_v54, %v1149_v17  ;;  %v1408_v4 = vmul.f32 2.0, %v1348_v41  ;;  %v1403_v43 = vmul.f32 %v1348_v41, %v1348_v41  ;;  %v2074_v41 = vld [vmem:[%s3137_s3] ss:$0 sm:$0xff] }
 0x369   : > { %v1122_v21 = vadd.f32 %v1118_v14, %v1112_v15 }
 0x36a   : > { %1283 = vmatmul.f32.vlgmr.msrb.gmra.mxu2 %v1183_v18  ;;  %1338 = vmatmul.f32.gmra.mxu0 %v1210_v20  ;;  %v1409_v47 = vmul.f32 %v1408_v4, %v1349_v42  ;;  %v1405_v49 = vperm.slane %v1403_v43, 0 }
 0x36b   : > { %v1126_v22 = vmax.f32 %v1122_v21, 0.0 }
 0x36c   : > { %v1411_v6 = vperm.slane %v1409_v47, 0 }
 0x36d   : > { %v1137_v23 = vrot.slane %v1126_v22, 7  ;;  %v1150_v24 = vrot.slane %v1126_v22, 1  ;;  %1315 = vmatmul.f32.gmra.mxu3 %v1126_v22  ;;  %v1523_v22 = vld [vmem:[%s3082_s15 + $0x78] sm:$0xff] }
 0x36e   : > { %1531 = vmatpush.msra.mxu0 %v1523_v22  ;;  %v2949_v22 = vld [vmem:[#allocation8 + $0xd0] sm:$0xff] }
 0x36f   : > { %v1138_v25 = vsel %vm1131_vm8, %v1135_v9, %v1137_v23  ;;  %v1151_v26 = vsel %vm1144_vm9, %v1148_v10, %v1150_v24  ;;  %v1156_v29 = vsel %vm1144_vm9, %v1150_v24, 0.0  ;;  %v1522_v23 = vld [vmem:[%s3082_s15 + $0x70] sm:$0xff] }
 0x370   : > { %v1184_v27 = vmul.f32 %v1179_v61, %v1138_v25  ;;  %v1211_v45 = vmul.f32 %v2819_v55, %v1151_v26  ;;  %v1212_v31 = vmul.f32 %v1207_v30, %v1156_v29  ;;  %v1521_v25 = vld [vmem:[%s3082_s15 + $0x68] sm:$0xff]  ;;  %1532 = vmatpush.msra.mxu0 %v1522_v23  ;;  %v1519_v29 = vld [vmem:[%s3082_s15 + $0x58] sm:$0xff] }
 0x371   : > { %v1692_v23 = vld [vmem:[#allocation8 + $0x48] sm:$0xff] }
 0x372   : > { %1286 = vmatmul.f32.gmra.mxu2 %v1184_v27  ;;  %1341 = vmatmul.f32.gmra.mxu0 %v1211_v45  ;;  %v1520_v27 = vld [vmem:[%s3082_s15 + $0x60] sm:$0xff] }
 0x373   : > { %1533 = vmatpush.msra.mxu0 %v1521_v25  ;;  %v1691_v25 = vld [vmem:[#allocation8 + $0x40] sm:$0xff] }
 0x375   : > { %1534 = vmatpush.msra.mxu0 %v1520_v27  ;;  %v1690_v27 = vld [vmem:[#allocation8 + $0x38] sm:$0xff] }
 0x377   : > { %1535 = vmatpush.msra.mxu0 %v1519_v29  ;;  %v1689_v29 = vld [vmem:[#allocation8 + $0x30] sm:$0xff] }
 0x37a   : > { %1344 = vmatmul.f32.gmra.mxu0 %v1212_v31  ;;  %v1518_v31 = vld [vmem:[%s3082_s15 + $0x50] sm:$0xff] }
 0x37b   : > { %1536 = vmatpush.msra.mxu0 %v1518_v31  ;;  %v1688_v31 = vld [vmem:[#allocation8 + $0x28] sm:$0xff] }
 0x3d7   : > { %v1278_v54 = vpop.f32.mrf.mxu1 }
 0x3d8   : > { %v1307_v32 = vpop.f32.mrf.mxu3 }
 0x3d9   : > { %v1308_v48 = vadd.f32 %v1307_v32, %v1278_v54 }
 0x3df   : > { %v1336_v33 = vpop.f32.mrf.mxu0  ;;  %v1281_v59 = vpop.f32.mrf.mxu1 }
 0x3e0   : > { %v1310_v35 = vpop.f32.mrf.mxu3  ;;  %v2848_v2 = vadd.f32 %v1336_v33, %v1308_v48  ;;  %v1517_v33 = vld [vmem:[%s3082_s15 + $0x48] sm:$0xff]  ;;  %v1512_v48 = vld [vmem:[%s3082_s15 + $0x20] sm:$0xff] }
 0x3e1   : > { %v1311_v0 = vadd.f32 %v1310_v35, %v1281_v59  ;;  %1537 = vmatpush.msra.mxu0 %v1517_v33  ;;  %v2076_v33 = vld [vmem:[%s3085_s18] ss:$0 sm:$0xff] }
 0x3e2   : > { %v1370_v40 = vmul.f32 %v2848_v2, %v2848_v2 }
 0x3e7   : > { %v1339_v52 = vpop.f32.mrf.mxu0 }
 0x3e8   : > { %v1313_v56 = vpop.f32.mrf.mxu3  ;;  %v2843_v37 = vadd.f32 %v1339_v52, %v1311_v0  ;;  %v1513_v0 = vld [vmem:[%s3082_s15 + $0x28] sm:$0xff] }
 0x3ea   : > { %v1371_v39 = vmul.f32 %v2843_v37, %v2843_v37 }
 0x3ed   : > { %v1284_v57 = vpop.f32.mrf.mxu2 }
 0x3ee   : > { %v1314_v60 = vadd.f32 %v1313_v56, %v1284_v57 }
 0x3ef   : > { %v1342_v58 = vpop.f32.mrf.mxu0 }
 0x3f0   : > { %v1316_v61 = vpop.f32.mrf.mxu3  ;;  %v2839_v36 = vadd.f32 %v1342_v58, %v1314_v60 }
 0x3f2   : > { %v1372_v3 = vmul.f32 %v2839_v36, %v2839_v36 }
 0x3f5   : > { %v1287_v62 = vpop.f32.mrf.mxu2 }
 0x3f6   : > { %v1317_v55 = vadd.f32 %v1316_v61, %v1287_v62  ;;  %v1516_v62 = vld [vmem:[%s3082_s15 + $0x40] sm:$0xff] }
 0x3f7   : > { %v1345_v63 = vpop.f32.mrf.mxu0  ;;  %1538 = vmatpush.msra.mxu0 %v1516_v62  ;;  %v1684_v62 = vld [vmem:[#allocation8 + $0x8] sm:$0xff] }
 0x3f8   : > { %v2841_v1 = vadd.f32 %v1345_v63, %v1317_v55  ;;  %v1515_v55 = vld [vmem:[%s3082_s15 + $0x38] sm:$0xff]  ;;  %v1514_v63 = vld [vmem:[%s3082_s15 + $0x30] sm:$0xff] }
 0x3f9   : > { %1539 = vmatpush.msra.mxu0 %v1515_v55  ;;  %v1700_v55 = vld [vmem:[#allocation8 + $0x88] sm:$0xff] }
 0x3fa   : > { %v1373_v38 = vmul.f32 %v2841_v1, %v2841_v1  ;;  %1362 = vmatpush.msra.mxu2 %v2841_v1 }
 0x3fb   : > { %1540 = vmatpush.msra.mxu0 %v1514_v63  ;;  %v1683_v63 = vld [vmem:[#allocation8] sm:$0xff] }
 0x3fc   : > { %1363 = vmatpush.msra.mxu2 %v2839_v36  ;;  %1386 = vmatpush.msra.mxu1 %v1373_v38  ;;  %v1511_v38 = vld [vmem:[%s3082_s15 + $0x18] sm:$0xff] }
 0x3fd   : > { %1541 = vmatpush.msra.mxu0 %v1513_v0  ;;  %v1699_v0 = vld [vmem:[#allocation8 + $0x80] sm:$0xff] }
 0x3fe   : > { %1364 = vmatpush.msra.mxu2 %v2843_v37  ;;  %1387 = vmatpush.msra.mxu1 %v1372_v3  ;;  %v1510_v3 = vld [vmem:[%s3082_s15 + $0x10] sm:$0xff] }
 0x3ff   : > { %1542 = vmatpush.msra.mxu0 %v1512_v48  ;;  %v2087_v48 = vld [vmem:[%s2484_s4] sm:$0xff] }
 0x400   : > { %1365 = vmatpush.msra.mxu2 %v2848_v2  ;;  %1388 = vmatpush.msra.mxu1 %v1371_v39  ;;  %v1509_v39 = vld [vmem:[%s3082_s15 + $0x8] sm:$0xff] }
 0x401   : > { %1936 = vmatmul.msk.f32.vlgmr.msra.gmra.mxu2 %vm874_vm1, %v2607_v51  ;;  %1543 = vmatpush.msra.mxu0 %v1511_v38  ;;  %v2088_v38 = vld [vmem:[%s2484_s4 + $0x8] sm:$0xff] }
 0x402   : > { %1389 = vmatpush.msra.mxu1 %v1370_v40  ;;  %1482 = vmatpush.msrb.mxu2 %v2725_v28  ;;  %v1398_v28 = vmul.f32 16.0, %v1349_v42  ;;  %v1508_v40 = vld [vmem:[%s3082_s15] sm:$0xff] }
 0x403   : > { %1937 = vmatmul.msk.f32.vlgmr.msra.gmra.mxu1 %vm874_vm1, %v2607_v51  ;;  %v2873_v51 = vld [vmem:[%s3136_s19] ss:$0 sm:$0xff]  ;;  %1544 = vmatpush.msra.mxu0 %v1510_v3 }
 0x404   : > { %v1400_v14 = vperm.slane %v1398_v28, 0 }
 0x405   : > { %1545 = vmatpush.msra.mxu0 %v1509_v39 }
 0x407   : > { %1546 = vmatpush.msra.mxu0 %v1508_v40  ;;  %v2089_v40 = vld [vmem:[%s2484_s4 + $0x10] sm:$0xff] }
 0x409   : > { %1744 = vmatpush.msrb.mxu0 %v2949_v22 }
 0x480   : > { %v1391_v53 = vpop.f32.mrf.mxu1 }
 0x481   : > { %v1407_v8 = vmul.f32 %v1405_v49, %v1391_v53 }
 0x484   : > { %v2875_v9 = vpop.f32.mrf.mxu2 }
 0x485   : > { %v1413_v10 = vmul.f32 %v1411_v6, %v2875_v9  ;;  %v1397_v13 = vmul.f32 %v2873_v51, %v2875_v9  ;;  %v1500_v7 = vrot.slane %v2875_v9, 6  ;;  %v1698_v9 = vld [vmem:[#allocation8 + $0x78] sm:$0xff] }
 0x487   : > { %v1414_v44 = vadd.f32 %v1413_v10, %v1407_v8  ;;  %v1402_v15 = vadd.f32 %v1400_v14, %v1397_v13 }
 0x489   : > { %v1420_v17 = vadd.f32 %v1418_v12, %v1414_v44 }
 0x48b   : > { %v1422_v18 = vrot.slane %v1420_v17, 6  ;;  %v1697_v17 = vld [vmem:[#allocation8 + $0x70] sm:$0xff] }
 0x48d   : > { %v1424_v20 = vsel %vm952_vm2, %v1402_v15, %v1422_v18  ;;  %v1696_v15 = vld [vmem:[#allocation8 + $0x68] sm:$0xff]  ;;  %v1695_v18 = vld [vmem:[#allocation8 + $0x60] sm:$0xff] }
 0x48e   : > { %1441 = vmatmul.f32.vlgmr.msra.gmra.mxu3 %v1424_v20  ;;  %v1694_v20 = vld [vmem:[#allocation8 + $0x58] sm:$0xff] }
 0x511   : > { %v1442_v21 = vpop.f32.mrf.mxu3 }
 0x512   : > { %v1445_v24 = vmul.f32 0.00390625, %v1442_v21  ;;  %v1693_v21 = vld [vmem:[#allocation8 + $0x50] sm:$0xff] }
 0x514   : > { %v1446_v26 = vmul.f32 %v1445_v24, %v1445_v24 }
 0x516   : > { %v1448_v45 = vrot.slane %v1446_v26, 6  ;;  %v2955_v26 = vld [vmem:[#allocation8 + $0xc0] sm:$0xff] }
 0x518   : > { %v1450_v30 = vsub.f32 %v1445_v24, %v1448_v45  ;;  %v2958_v45 = vld [vmem:[#allocation8 + $0xb8] sm:$0xff] }
 0x51a   : > { %v1451_v32 = vmax.f32 %v1450_v30, 0.0  ;;  %v2960_v30 = vld [vmem:[#allocation8 + $0xb0] sm:$0xff] }
 0x51c   : > { %v1452_v35 = vadd.f32 1e-05, %v1451_v32  ;;  %v2963_v32 = vld [vmem:[#allocation8 + $0xa8] sm:$0xff] }
 0x51e   : > { %2081 = vrsqrt.f32 %v1452_v35  ;;  %vm1459_vm11 = vweird.f32 %v1452_v35 }
 0x524   : > { %v2082_v52 = vpop.eup %2081 }
 0x525   : > { %v1454_v54 = vmul.f32 %v2082_v52, %v1452_v35  ;;  %vm1460_vm10 = vweird.f32 %v2082_v52 }
 0x526   : > { %vm1461_vm12 = vmor %vm1459_vm11, %vm1460_vm10 }
 0x527   : > { %v1455_v56 = vmul.f32 %v2082_v52, %v1454_v54  ;;  %v2970_v54 = vld [vmem:[#allocation8 + $0xa0] sm:$0xff] }
 0x529   : > { %v1456_v57 = vmul.f32 0.5, %v1455_v56 }
 0x52b   : > { %v1457_v58 = vsub.f32 1.5, %v1456_v57  ;;  %v1686_v57 = vld [vmem:[#allocation8 + $0x18] sm:$0xff] }
 0x52d   : > { %v1458_v59 = vmul.f32 %v2082_v52, %v1457_v58  ;;  %v2973_v58 = vld [vmem:[#allocation8 + $0x98] sm:$0xff] }
 0x52f   : > { %v1462_v60 = vsel %vm1461_vm12, %v2082_v52, %v1458_v59  ;;  %v1687_v52 = vld [vmem:[#allocation8 + $0x20] sm:$0xff] }
 0x530   : > { %v1463_v61 = vsel %vm952_vm2, %v1445_v24, %v1462_v60  ;;  %v2952_v24 = vld [vmem:[#allocation8 + $0xc8] sm:$0xff]  ;;  %v1685_v60 = vld [vmem:[#allocation8 + $0x10] sm:$0xff] }
 0x531   : > { %1938 = vmatmul.msk.f32.vlgmr.msrb.gmra.mxu2 %vm993_vm6, %v1463_v61  ;;  %1745 = vmatpush.msrb.mxu0 %v2952_v24  ;;  %v1701_v61 = vld [vmem:[#allocation8 + $0x90] sm:$0xff] }
 0x533   : > { %1746 = vmatpush.msrb.mxu0 %v2955_v26 }
 0x535   : > { %1747 = vmatpush.msrb.mxu0 %v2958_v45 }
 0x537   : > { %1748 = vmatpush.msrb.mxu0 %v2960_v30 }
 0x539   : > { %1749 = vmatpush.msrb.mxu0 %v2963_v32 }
 0x53b   : > { %1750 = vmatpush.msrb.mxu0 %v2970_v54 }
 0x53d   : > { %1751 = vmatpush.msrb.mxu0 %v2973_v58 }
 0x53f   : > { %1752 = vmatpush.msrb.mxu0 %v1701_v61 }
 0x541   : > { %1753 = vmatpush.msrb.mxu0 %v1700_v55 }
 0x543   : > { %1754 = vmatpush.msrb.mxu0 %v1699_v0 }
 0x5b4   : > { %v1484_v4 = vpop.f32.mrf.mxu2 }
 0x5b5   : > { %v1492_v42 = vsub.f32 %v2074_v41, %v1484_v4  ;;  %v1494_v43 = vrot.slane %v1484_v4, 2  ;;  %v1487_v47 = vmul.f32 %v2873_v51, %v1484_v4  ;;  %v1552_v51 = vld [vmem:[%s3084_s17] sm:$0x1] }
 0x5b6   : > { %1939 = vmatpush.msk.msrb.mxu1 %vm1131_vm8, %v1552_v51  ;;  %v2090_v41 = vld [vmem:[%s2484_s4 + $0x18] sm:$0xff] }
 0x5b7   : > { %v1496_v46 = vmul.f32 %v1494_v43, %v1492_v42  ;;  %v2937_v53 = vmul.f32 %v2742_v5, %v1487_v47 }
 0x5b8   : > { %1710 = vmatpush.msra.mxu1 %v1698_v9  ;;  %v2077_v9 = vld [vmem:[%s3138_s24] ss:$0 sm:$0xff] }
 0x5b9   : > { %v1497_v49 = vmul.f32 %v2742_v5, %v1496_v46  ;;  %v1502_v8 = vmul.f32 %v1500_v7, %v2937_v53  ;;  %v2075_v5 = vld [vmem:[#allocation2] ss:$0 sm:$0xff]  ;;  %v2091_v7 = vld [vmem:[%s2484_s4 + $0x20] sm:$0xff] }
 0x5ba   : > { %1711 = vmatpush.msra.mxu1 %v1697_v17 }
 0x5bb   : > { %v2940_v6 = vadd.f32 %v2757_v16, %v1497_v49 }
 0x5bc   : > { %1712 = vmatpush.msra.mxu1 %v1696_v15 }
 0x5bd   : > { %v1503_v28 = vmul.f32 16.0, %v2940_v6 }
 0x5be   : > { %1713 = vmatpush.msra.mxu1 %v1695_v18 }
 0x5bf   : > { %v1505_v10 = vrot.slane %v1503_v28, 6  ;;  %v2092_v28 = vld [vmem:[%s2484_s4 + $0x28] sm:$0xff] }
 0x5c0   : > { %1714 = vmatpush.msra.mxu1 %v1694_v20  ;;  %v2078_v20 = vld [vmem:[%s3139_s1] ss:$0 sm:$0xff]  ;;  %s2201_s1 = scalar_lea.hbm %s2200_s2, 32 }
 0x5c1   : > { %v1507_v12 = vadd.f32 %v1505_v10, %v1502_v8  ;;  %p2202_p1 = scmp.ne.s32.totalorder %s2200_s2, %s2201_s1  ;;  %p2207_p2 = scmp.lt.s32.totalorder %s2205_s20, %s2201_s1 }
 0x5c2   : > { %1715 = vmatpush.msra.mxu1 %v1693_v21 }
 0x5c3   : > { %v1529_v13 = vrot.slane %v1507_v12, 2  ;;  %p2203_p4 = pnand %p2202_p1, %p2450_p3  ;;  %p2208_p9 = por %p2207_p2, %p2206_p11 }
 0x5c4   : > { %1716 = vmatpush.msra.mxu1 %v1692_v23 }
 0x5c5   : > { %1547 = vmatmul.f32.vlgmr.msra.gmra.mxu0 %v1529_v13  ;;  %p2204_p8 = pneg %p2203_p4 }
 0x5c6   : > { %1717 = vmatpush.msra.mxu1 %v1691_v25 }
 0x5c7   : > { %p2209_p10 = pnand %p2208_p9, %p2204_p8 }
 0x5c8   : > { %1718 = vmatpush.msra.mxu1 %v1690_v27 }
 0x5ca   : > { %1719 = vmatpush.msra.mxu1 %v1689_v29 }
 0x5cc   : > { %1720 = vmatpush.msra.mxu1 %v1688_v31 }
 0x5cd   : > { %1953 = vmatmul.msk.f32.vlgmr.msrb.gmra.mxu0 %vm801_vm0, %v2088_v38 }
 0x5ce   : > { %1721 = vmatpush.msra.mxu1 %v1687_v52 }
 0x5d0   : > { %1722 = vmatpush.msra.mxu1 %v1686_v57 }
 0x5d2   : > { %1723 = vmatpush.msra.mxu1 %v1685_v60 }
 0x5d4   : > { %1724 = vmatpush.msra.mxu1 %v1684_v62 }
 0x5d5   : > { %1954 = vmatmul.msk.f32.gmra.mxu0 %vm801_vm0, %v2090_v41 }
 0x5d6   : > { %1725 = vmatpush.msra.mxu1 %v1683_v63 }
 0x5dd   : > { %1955 = vmatmul.msk.f32.gmra.mxu0 %vm801_vm0, %v2092_v28 }
 0x642   : > { %v1548_v14 = vpop.f32.mrf.mxu0 }
 0x643   : > { %v1549_v16 = vadd.f32 %v2075_v5, %v1548_v14 }
 0x645   : > { %v1551_v44 = vmax.f32 %v1549_v16, 0.0  ;;  %v2093_v16 = vld [vmem:[%s2484_s4 + $0x30] sm:$0xff] }
 0x647   : > { %1940 = vmatmul.msk.f32.vlgmr.msrb.gmra.mxu1 %vm1557_vm13, %v1551_v44 }
 0x64f   : > { %1726 = vmatmul.f32.vlgmr.msra.gmra.mxu1 %v2087_v48 }
 0x657   : > { %1729 = vmatmul.f32.gmra.mxu1 %v2089_v40 }
 0x65f   : > { %1732 = vmatmul.f32.gmra.mxu1 %v2091_v7 }
 0x667   : > { %1735 = vmatmul.f32.gmra.mxu1 %v2093_v16 }
 0x6c4   : > { %v1581_v35 = vpop.f32.mrf.mxu1 }
 0x6c5   : > { %v1582_v56 = vadd.f32 %v2076_v33, %v1581_v35 }
 0x6c7   : > { %v1941_v59 = vmul.f32 -1.442695, %v1582_v56 }
 0x6c9   : > { %2083 = vpow2.f32 %v1941_v59 }
 0x6cf   : > { %v2084_v3 = vpop.eup %2083 }
 0x6d0   : > { %v1587_v39 = vadd.f32 1.0, %v2084_v3 }
 0x6d2   : > { %2085 = vrcp.f32 %v1587_v39  ;;  %v1599_v47 = vand.u32 2147483648, %v1587_v39  ;;  %v1597_v49 = vand.u32 2147483647, %v1587_v39  ;;  %vm1593_vm15 = vweird.f32 %v1587_v39 }
 0x6d4   : > { %v1600_v10 = vor.u32 1.1754944e-38, %v1599_v47  ;;  %vm1598_vm3 = vcmp.eq.f32.partialorder %v1597_v49, 8.507059e+37 }
 0x6d8   : > { %v2086_v4 = vpop.eup %2085 }
 0x6d9   : > { %v1589_v42 = vmul.f32 %v2086_v4, %v1587_v39  ;;  %vm1594_vm14 = vweird.f32 %v2086_v4 }
 0x6da   : > { %vm1595_vm1 = vmor %vm1593_vm15, %vm1594_vm14 }
 0x6db   : > { %v1590_v43 = vsub.f32 1.0, %v1589_v42 }
 0x6dd   : > { %v1591_v46 = vmul.f32 %v2086_v4, %v1590_v43 }
 0x6df   : > { %v1592_v8 = vadd.f32 %v2086_v4, %v1591_v46 }
 0x6e1   : > { %v1596_v12 = vsel %vm1595_vm1, %v2086_v4, %v1592_v8 }
 0x6e2   : > { %v1601_v13 = vsel %vm1598_vm3, %v1600_v10, %v1596_v12 }
 0x6e3   : > { %v1604_v51 = vrot.slane %v1601_v13, 6  ;;  %v1607_v5 = vmul.f32 %v1601_v13, %v2940_v6 }
 0x6e5   : > { %1948 = vmatpush.msk.msrb.mxu3 %vm952_vm2, %v1607_v5  ;;  %v1606_v14 = vmul.f32 %v1604_v51, %v2937_v53  ;;  %v1756_v53 = vpop.f32.mrf.mxu0 }
 0x6e6   : > { %1949 = vmatmul.msk.f32.vlgmr.msrb.gmra.mxu3 %vm1040_vm7, %v2763_v19 }
 0x6e7   : > { %v1611_v44 = vrot.slane %v1606_v14, 2  ;;  %1981 = vmatpush.msra.mxu3 %v2949_v22 }
 0x6e9   : > { %1943 = vmatpush.msk.msra.mxu2 %vm952_vm2, %v1611_v44  ;;  %1982 = vmatpush.msra.mxu3 %v2952_v24 }
 0x6ea   : > { %1944 = vmatmul.msk.f32.vlgmr.msra.gmra.mxu2 %vm1040_vm7, %v2763_v19  ;;  %v2094_v19 = vld [vmem:[%s2484_s4 + $0x38] sm:$0xff]  ;;  %s1917_s4 = sshll.u32 %s2480_s5, 5 }
 0x6eb   : > { %1983 = vmatpush.msra.mxu3 %v2955_v26  ;;  %s3024_s23 = scalar_lea.vmem [#allocation9], %s1917_s4 }
 0x6ec   : > { %s1809_s24 = sshll.u32 %s3024_s23, 4  ;;  %s1810_s24 = int_to_ptr.vmem [resolvable:$true] %s1809_s24 }
 0x6ed   : > { %1984 = vmatpush.msra.mxu3 %v2958_v45  ;;  %v1759_v15 = vpop.f32.mrf.mxu0 }
 0x6ee   : > { %1950 = vmatmul.msk.f32.gmra.mxu3 %vm1040_vm7, %v2784_v34 }
 0x6ef   : > { %1985 = vmatpush.msra.mxu3 %v2960_v30 }
 0x6f1   : > { %1986 = vmatpush.msra.mxu3 %v2963_v32 }
 0x6f2   : > { %1945 = vmatmul.msk.f32.gmra.mxu2 %vm1040_vm7, %v2784_v34  ;;  %v1727_v34 = vpop.f32.mrf.mxu1 }
 0x6f3   : > { %1987 = vmatpush.msra.mxu3 %v2970_v54  ;;  %v1757_v6 = vadd.f32 %v1756_v53, %v1727_v34 }
 0x6f5   : > { %1988 = vmatpush.msra.mxu3 %v2973_v58  ;;  %v1772_v18 = vmul.f32 %v2077_v9, %v1757_v6  ;;  %v1762_v29 = vpop.f32.mrf.mxu0 }
 0x6f6   : > { %1951 = vmatmul.msk.f32.gmra.mxu3 %vm1040_vm7, %v2793_v50 }
 0x6f7   : > { %1989 = vmatpush.msra.mxu3 %v1701_v61  ;;  %v1780_v21 = vadd.f32 %v2078_v20, %v1772_v18 }
 0x6f9   : > { %1990 = vmatpush.msra.mxu3 %v1700_v55 }
 0x6fa   : > { %1946 = vmatmul.msk.f32.gmra.mxu2 %vm1040_vm7, %v2793_v50  ;;  %v1730_v17 = vpop.f32.mrf.mxu1 }
 0x6fb   : > { %1991 = vmatpush.msra.mxu3 %v1699_v0  ;;  %v1760_v23 = vadd.f32 %v1759_v15, %v1730_v17 }
 0x6fd   : > { %v1773_v27 = vmul.f32 %v2077_v9, %v1760_v23 }
 0x6fe   : > { %1952 = vmatmul.msk.f32.gmra.mxu3 %vm1040_vm7, %v2802_v11 }
 0x6ff   : > { %v1781_v32 = vadd.f32 %v2078_v20, %v1773_v27 }
 0x702   : > { %1947 = vmatmul.msk.f32.gmra.mxu2 %vm1040_vm7, %v2802_v11  ;;  %v1733_v45 = vpop.f32.mrf.mxu1 }
 0x706   : > { %1956 = vmatmul.msk.f32.vlgmr.msra.gmra.mxu3 %vm801_vm0, %v2094_v19 }
 0x769   : > { %v1663_v50 = vpop.f32.mrf.mxu3 }
 0x76d   : > { %v1634_v11 = vpop.f32.mrf.mxu2 }
 0x76e   : > { %v1675_v22 = vmul.f32 %v1634_v11, %v2848_v2  ;;  %v1763_v2 = vadd.f32 %v1762_v29, %v1733_v45 }
 0x770   : > { %v1679_v24 = vadd.f32 %v1675_v22, %v1663_v50  ;;  %v1774_v56 = vmul.f32 %v2077_v9, %v1763_v2 }
 0x771   : > { %v1666_v25 = vpop.f32.mrf.mxu3 }
 0x772   : > { %v1784_v26 = vadd.f32 %v1780_v21, %v1679_v24  ;;  %v1782_v59 = vadd.f32 %v2078_v20, %v1774_v56 }
 0x774   : > { %v1788_v30 = vmax.f32 %v1784_v26, 0.0 }
 0x775   : > { %v1637_v31 = vpop.f32.mrf.mxu2 }
 0x776   : > { %1792 = vst [vmem:[%s3024_s23] sm:$0xff] %v1788_v30  ;;  %v1676_v33 = vmul.f32 %v1637_v31, %v2843_v37  ;;  %v1736_v37 = vpop.f32.mrf.mxu1 }
 0x778   : > { %v1680_v35 = vadd.f32 %v1676_v33, %v1666_v25 }
 0x779   : > { %v1669_v52 = vpop.f32.mrf.mxu3 }
 0x77a   : > { %v1785_v54 = vadd.f32 %v1781_v32, %v1680_v35 }
 0x77c   : > { %v1789_v57 = vmax.f32 %v1785_v54, 0.0 }
 0x77d   : > { %v1640_v58 = vpop.f32.mrf.mxu2 }
 0x77e   : > { %1793 = vst [vmem:[%s3024_s23 + $0x8] sm:$0xff] %v1789_v57  ;;  %v1677_v60 = vmul.f32 %v1640_v58, %v2839_v36 }
 0x780   : > { %v1681_v61 = vadd.f32 %v1677_v60, %v1669_v52 }
 0x781   : > { %v1672_v62 = vpop.f32.mrf.mxu3 }
 0x782   : > { %v1786_v55 = vadd.f32 %v1782_v59, %v1681_v61 }
 0x784   : > { %v1790_v63 = vmax.f32 %v1786_v55, 0.0 }
 0x785   : > { %v1643_v0 = vpop.f32.mrf.mxu2 }
 0x786   : > { %1794 = vst [vmem:[%s3024_s23 + $0x10] sm:$0xff] %v1790_v63  ;;  %v1678_v38 = vmul.f32 %v1643_v0, %v2841_v1 }
 0x788   : > { %v1682_v39 = vadd.f32 %v1678_v38, %v1672_v62 }
 0x789   : > { %v1765_v48 = vpop.f32.mrf.mxu3 }
 0x78a   : > { %v1766_v3 = vadd.f32 %v1765_v48, %v1736_v37 }
 0x78c   : > { %v1775_v36 = vmul.f32 %v2077_v9, %v1766_v3 }
 0x78e   : > { %v1783_v40 = vadd.f32 %v2078_v20, %v1775_v36 }
 0x790   : > { %v1787_v41 = vadd.f32 %v1783_v40, %v1682_v39 }
 0x792   : > { %v1791_v4 = vmax.f32 %v1787_v41, 0.0 }
 0x794   : > { %1795 = vst [vmem:[%s3024_s23 + $0x18] sm:$0xff] %v1791_v4 }
 0x795   : > { %2212 = shalt.err (!%p2209_p10)
}
 0x796   : > { %s2264_s5 = smov 128   ;;  %s2265_s23 = smov 8  }
 0x797   : > { %2002 = dma.vmem_to_hbm [thread:$0]  (%p2450_p3), %s1810_s24, 512, %s1812_s6, %s1797_s16, %s2264_s5, %s2264_s5, %s2265_s23  }
 0x798 PF: > { %s3141_s22 = sld [smem:[#allocation13_spill]]  ;;  %p3143_p12 = scmp.ge.s32.totalorder %s2255_s0, 2 }
 0x79a   : > { %p2016_p13 = pnand %p3143_p12, %p2419_p6 }
 0x79c   : > { %p2017_p0 = pneg %p2016_p13 }
 0x79e   : > { %s1826_s8 = sand.u32 1, %s3141_s22  }
 0x79f   : > { %s1827_s3 = scalar_lea.sflag [#allocation5], %s1826_s8 }
 0x7a0   : > { %2238 = dma.done.wait (%p2017_p0), %s1827_s3, 512  }
 0x7a1   : > { %2240 = vsyncadd (%p2017_p0), %s1827_s3, 4294966784  ;;  %s3144_s0 = sld [smem:[#allocation16_spill]]  ;;  %s3147_s29 = smov %s2247_s30 }
 0x7a2   : > { %s3145_s2 = sld [smem:[#allocation14_spill]] }
 0x7a3   : > { %s3146_s4 = sld [smem:[#allocation17_spill]] }
 0x7a7   : > { %p38_p5 = scmp.ge.s32.totalorder %s3144_s0, 4  }
 0x7a8   : > { %s3148_s30 = smov %s3145_s2 }
 0x7a9   :  { %40 = sbr.rel (!%p38_p5) target bundleno = 20 (0x14), region = 161 }
 0x7ae   :  { %1833 = vsyncpa [#allocation4], 1 }
 0x7af   :  { %1835 = vsyncpa [#allocation4 + $0x1], 1 }
 0x7b0   :  { %1836 = vsyncpa [#allocation7], 1 }
 0x7b1   :  { %1837 = vsyncpa [#allocation5], 1 }
 0x7b2   :  { %1839 = vsyncpa [#allocation5 + $0x1], 1 }

</bundles_post_ra>
